<compile_context>
chip_gen: v6e
topology: v6e:2x2x1
jax: 0.10.0
libtpu: 0.0.40
codegen_flags: <defaults>
</compile_context>

<pallas_src>
import jax
import jax.numpy as jnp
from jax.experimental import pallas as pl
from jax.experimental.pallas import tpu as pltpu

PAD_TOKEN_ID = 1


def _vmem_budget_bytes():
    # ~75% of the per-TC VMEM: ~96 MiB on v5e/v6e (128 MiB parts), ~48 MiB on
    # v7x (64 MiB part) -- leaves headroom for compiler-internal scratch.
    try:
        cap = pltpu.get_tpu_info().vmem_capacity_bytes
    except Exception:  # conservative fallback if the query is unavailable
        cap = 64 * 1024 * 1024
    return int(cap * 3 // 4)


# ----------------------------------------------------------------------------
# Kernel 1: single transformer encoder layer, TB sequences per grid step,
# emitting only the CLS hidden state.
#   x_ref    : (TB, S, H)  bf16  token embeddings (positional added in-kernel)
#   bias_ref : (TB, 1, S)  f32   additive attention bias (0 real / -1e9 pad)
#   pos/w*   : bf16, constant index maps, single-buffered
#   out_ref  : (TB, H)     bf16  CLS hidden state
# ----------------------------------------------------------------------------
def _encoder_cls_kernel(x_ref, bias_ref, pos_ref, wq_ref, wk_ref, wv_ref,
                        wo_ref, w1_ref, w2_ref, out_ref):
    tb, s, h = x_ref.shape
    x = x_ref[...] + pos_ref[...]                        # (TB, S, H) bf16
    x_flat = x.reshape(tb * s, h)

    # Keys / values need every position: one (TB*S, H) x (H, H) MXU matmul
    # each, bf16 inputs with f32 accumulation.
    k = jnp.dot(x_flat, wk_ref[...], preferred_element_type=jnp.float32)
    v = jnp.dot(x_flat, wv_ref[...], preferred_element_type=jnp.float32)
    k3 = k.reshape(tb, s, h).astype(jnp.bfloat16)
    v3 = v.reshape(tb, s, h).astype(jnp.bfloat16)

    # Downstream consumes only hidden[:, 0, :]; for this single-layer encoder
    # the CLS output depends on the position-0 query only, so the query /
    # attention / output-proj / FFN paths are computed for that row alone
    # (S x less writeback and compute, no big softmax/FFN temporaries).
    x0 = x[:, 0, :]                                      # (TB, H) bf16, CLS row
    q0 = jnp.dot(x0, wq_ref[...],                        # 1/sqrt(H) pre-folded
                 preferred_element_type=jnp.float32)
    q3 = q0.reshape(tb, 1, h).astype(jnp.bfloat16)

    # Contract the last axes directly (no transposes -> no XLU vxpose).
    scores = jnp.einsum('bqd,bkd->bqk', q3, k3,
                        preferred_element_type=jnp.float32)   # (TB, 1, S)
    scores = scores + bias_ref[...]                      # pad-key mask, prebuilt
    scores = scores - jnp.max(scores, axis=-1, keepdims=True)
    e = jnp.exp(scores)
    # approx reciprocal -> EUP slot; tiny deviation from exact softmax is fine
    # for this synthetic encoder.
    inv_l = pl.reciprocal(jnp.sum(e, axis=-1, keepdims=True), approx=True)
    attn = (e * inv_l).astype(jnp.bfloat16)              # (TB, 1, S)

    a0 = jnp.einsum('bqk,bkd->bqd', attn, v3,
                    preferred_element_type=jnp.float32).reshape(tb, h)
    h_res = x0.astype(jnp.float32) + jnp.dot(
        a0.astype(jnp.bfloat16), wo_ref[...],
        preferred_element_type=jnp.float32)              # (TB, H) f32

    # FFN on the CLS row only: (TB, H) x (H, F) x (F, H); intermediate is tiny
    # so no F-tiling is required even at RoBERTa scale.
    ffn = jnp.dot(
        jax.nn.relu(
            jnp.dot(h_res.astype(jnp.bfloat16), w1_ref[...],
                    preferred_element_type=jnp.float32)).astype(jnp.bfloat16),
        w2_ref[...], preferred_element_type=jnp.float32)
    out_ref[...] = (h_res + ffn).astype(out_ref.dtype)


def encode_cls(token_ids, params, pad_token_id=PAD_TOKEN_ID, block_rows=512):
    """token_ids: (N, S) int32 -> CLS hidden state (N, H) bf16."""
    n, s = token_ids.shape
    hdim = params["emb"].shape[1]
    fdim = params["w1"].shape[1]

    # Rows fed to the K/V matmuls per grid step = tb * s.  Keep >= block_rows
    # (256-aligned rows keep v6e/v7x's 2x256^2 MXU full; 128 suffices for
    # v5e's 4x128^2), capped by the batch size.
    tb = max(1, min(n, max(1, block_rows // s)))
    blocks = pl.cdiv(n, tb)
    # v7x has 2 TensorCores: an odd grid on the 'parallel' axis leaves one
    # idle, so round up to an even number of blocks (no-op on v5e/v6e).
    if blocks > 1 and blocks % 2:
        blocks += 1
    n_pad = blocks * tb
    if n_pad != n:
        token_ids = jnp.concatenate(
            [token_ids,
             jnp.full((n_pad - n, s), pad_token_id, token_ids.dtype)], axis=0)

    # Additive attention bias built once here; the kernel only broadcast-adds.
    attn_bias = jnp.where(token_ids == pad_token_id, -1e9, 0.0
                          ).astype(jnp.float32).reshape(n_pad, 1, s)

    # TODO(synk): embedding row gather stays in XLA (one (N,S,H) bf16 HBM pass,
    # now the dominant residual HBM traffic); at real vocab size fuse it with
    # scalar-prefetched token ids + a DMA row gather.
    x = jnp.take(params["emb"], token_ids, axis=0).astype(jnp.bfloat16)

    # Constant-weight preprocessing (one-time, outside the kernel):
    # fold the 1/sqrt(H) attention scale into wq.
    wq_scaled = (params["wq"].astype(jnp.float32) * (hdim ** -0.5)
                 ).astype(jnp.bfloat16)
    pos = params["pos"].astype(jnp.bfloat16)

    def const_spec(shape):
        # Constant index map + single buffer: these blocks are fetched once and
        # never re-DMA'd, so double-buffering them is pure VMEM waste.
        return pl.BlockSpec(shape, lambda b: (0,) * len(shape),
                            pipeline_mode=pl.Buffered(1))

    out = pl.pallas_call(
        _encoder_cls_kernel,
        out_shape=jax.ShapeDtypeStruct((n_pad, hdim), jnp.bfloat16),
        grid=(blocks,),
        in_specs=[
            pl.BlockSpec((tb, s, hdim), lambda b: (b, 0, 0)),
            pl.BlockSpec((tb, 1, s), lambda b: (b, 0, 0)),
            const_spec((s, hdim)),
            const_spec((hdim, hdim)), const_spec((hdim, hdim)),
            const_spec((hdim, hdim)), const_spec((hdim, hdim)),
            const_spec((hdim, fdim)), const_spec((fdim, hdim)),
        ],
        out_specs=pl.BlockSpec((tb, hdim), lambda b: (b, 0)),
        compiler_params=pltpu.CompilerParams(
            dimension_semantics=("parallel",),
            vmem_limit_bytes=_vmem_budget_bytes()),
    )(x, attn_bias, pos, wq_scaled, params["wk"], params["wv"], params["wo"],
      params["w1"], params["w2"])
    return out[:n]


# ----------------------------------------------------------------------------
# Kernel 2: masked-mean cosine-similarity scoring, single program (whole batch).
#   score[b, c] = sum_d cos(cand[b,c], doc[b,d]) * mask[b,d] / sum_d mask[b,d]
# Matches torch.cosine_similarity's eps clamp; masked mean uses exact division.
# ----------------------------------------------------------------------------
def _cosine_score_kernel(cand_ref, doc_ref, mask_ref, out_ref):
    c = cand_ref[...].astype(jnp.float32)                # (B, C, H)
    d = doc_ref[...].astype(jnp.float32)                 # (B, D, H)
    m = mask_ref[...]                                    # (B, 1, D)
    eps = 1e-8                                           # torch default eps
    dots = jnp.einsum('bch,bdh->bcd', c, d,
                      preferred_element_type=jnp.float32)          # (B, C, D)
    c_norm = jnp.sqrt(jnp.sum(c * c, axis=-1, keepdims=True))      # (B, C, 1)
    d_norm = jnp.sqrt(jnp.sum(d * d, axis=-1))[:, None, :]         # (B, 1, D)
    cos = dots / jnp.maximum(c_norm * d_norm, eps)                 # (B, C, D)
    denom = jnp.sum(m, axis=-1)                                    # (B, 1)
    out_ref[...] = jnp.sum(cos * m, axis=-1) / denom               # exact div


def cosine_score(cand_emb, doc_emb_bdh, mask_bd):
    """cand_emb (B,C,H), doc_emb_bdh (B,D,H), mask_bd (B,D) -> (B,C) f32."""
    b, c, _ = cand_emb.shape
    d = doc_emb_bdh.shape[1]
    mask3 = mask_bd.reshape(b, 1, d).astype(jnp.float32)
    # TODO(synk): (B, C) output with C ~ 5 is lane-sparse (masked stores); cost
    # is negligible at this size -- pad C to 128 lanes only if B*C*D*H grows.
    return pl.pallas_call(
        _cosine_score_kernel,
        out_shape=jax.ShapeDtypeStruct((b, c), jnp.float32),
    )(cand_emb, doc_emb_bdh, mask3)


# ----------------------------------------------------------------------------
# ReRanker.forward
# ----------------------------------------------------------------------------
def reranker_forward(texts_id, candidate_id, summary_id, params,
                     pad_token_id=PAD_TOKEN_ID, require_gold=True,
                     block_rows=512):
    # texts_id: (D, B, S) int32, candidate_id: (B, C, S) int32, summary_id: (B, S)
    num_docs, batch_size, seq = texts_id.shape
    cand_num = candidate_id.shape[1]
    hidden = params["emb"].shape[1]
    n_doc = num_docs * batch_size
    n_cand = batch_size * cand_num

    # Fuse all encoder invocations (documents + candidates + gold summary) into
    # one pallas_call: amortizes launch / pipeline warm-up, keeps weights
    # resident, and gives the grid enough blocks to fill both v7x cores.
    pieces = [texts_id.reshape(n_doc, seq), candidate_id.reshape(n_cand, seq)]
    if require_gold:
        pieces.append(summary_id)
    all_ids = jnp.concatenate(pieces, axis=0)

    cls = encode_cls(all_ids, params, pad_token_id, block_rows)    # (N, H) bf16

    doc_embs = cls[:n_doc].reshape(num_docs, batch_size, hidden)   # (D, B, H)
    doc_emb_bdh = jnp.transpose(doc_embs, (1, 0, 2))               # (B, D, H)
    candidate_emb = cls[n_doc:n_doc + n_cand].reshape(batch_size, cand_num,
                                                      hidden)      # (B, C, H)

    # mask_for_sim: any non-pad token in positions [1:-1], per (doc, batch)
    input_mask = texts_id != pad_token_id                          # (D, B, S)
    mask_for_sim = jnp.any(input_mask[:, :, 1:-1],
                           axis=2).astype(jnp.float32).T           # (B, D)

    if require_gold:
        summary_emb = cls[n_doc + n_cand:n_doc + n_cand + batch_size]  # (B, H)
        query_emb = jnp.concatenate([candidate_emb, summary_emb[:, None, :]],
                                    axis=1)                        # (B, C+1, H)
    else:
        query_emb = candidate_emb

    # One scoring kernel covers candidates (+ gold summary), like the PyTorch
    # per-doc cosine loops collapsed into a single masked mean.
    scores = cosine_score(query_emb, doc_emb_bdh, mask_for_sim)    # (B, C[+1])

    output = {"score": scores[:, :cand_num]}
    if require_gold:
        output["summary_score"] = scores[:, cand_num]
    return output


# ----------------------------------------------------------------------------
# Deterministic parameter / input construction
# ----------------------------------------------------------------------------
def init_params(key, vocab, seq, hidden, ffn):
    ks = jax.random.split(key, 8)
    sc = 0.02

    def bf(k, shape):  # bf16 weights -> 2x MXU throughput, half DMA/VMEM bytes
        return (sc * jax.random.normal(k, shape, jnp.float32)).astype(jnp.bfloat16)

    return {
        "emb": bf(ks[0], (vocab, hidden)),
        "pos": sc * jax.random.normal(ks[1], (seq, hidden), jnp.float32),
        "wq": bf(ks[2], (hidden, hidden)),
        "wk": bf(ks[3], (hidden, hidden)),
        "wv": bf(ks[4], (hidden, hidden)),
        "wo": bf(ks[5], (hidden, hidden)),
        "w1": bf(ks[6], (hidden, ffn)),
        "w2": bf(ks[7], (ffn, hidden)),
    }


def make_ids(key, shape, vocab, seq):
    k_tok, k_len = jax.random.split(key)
    ids = jax.random.randint(k_tok, shape, 2, vocab)            # real tokens
    lens = jax.random.randint(k_len, shape[:-1], 3, seq)        # >= 3 real toks
    pos = jnp.arange(seq)
    ids = jnp.where(pos < lens[..., None], ids, PAD_TOKEN_ID)   # tail padding
    ids = ids.at[..., 0].set(0)                                 # CLS token id 0
    return ids.astype(jnp.int32)


if __name__ == "__main__":
    # TODO(synk): pretrained RoBERTa weights / multi-layer stack are replaced by
    # a single deterministic synthetic encoder layer.
    B, D, C, S, H, F, V = 2, 3, 4, 8, 32, 64, 64
    key = jax.random.PRNGKey(0)
    k_par, k_txt, k_cand, k_sum = jax.random.split(key, 4)

    params = init_params(k_par, vocab=V, seq=S, hidden=H, ffn=F)
    texts_id = make_ids(k_txt, (D, B, S), V, S)
    candidate_id = make_ids(k_cand, (B, C, S), V, S)
    summary_id = make_ids(k_sum, (B, S), V, S)

    # block_rows=64 so the toy run (N=16, S=8) still exercises >1 grid step;
    # at production scale leave the default (>=512 MXU rows per step).
    out = reranker_forward(texts_id, candidate_id, summary_id, params,
                           pad_token_id=PAD_TOKEN_ID, require_gold=True,
                           block_rows=64)
    jax.block_until_ready(out["score"])
    jax.block_until_ready(out["summary_score"])
    assert out["score"].shape == (B, C)
    assert out["summary_score"].shape == (B,)
    assert bool(jnp.all(jnp.isfinite(out["score"])))
    assert bool(jnp.all(jnp.isfinite(out["summary_score"])))
    print("KERNEL_OK")
</pallas_src>

<mosaic_0001>
module attributes {stable_mosaic.version = 11 : i64} {
  func.func @_encoder_cls_kernel(%arg0: i32, %arg1: memref<8x8x32xbf16, #tpu.memory_space<vmem>>, %arg2: memref<8x1x8xf32, #tpu.memory_space<vmem>>, %arg3: memref<8x32xbf16, #tpu.memory_space<vmem>>, %arg4: memref<32x32xbf16, #tpu.memory_space<vmem>>, %arg5: memref<32x32xbf16, #tpu.memory_space<vmem>>, %arg6: memref<32x32xbf16, #tpu.memory_space<vmem>>, %arg7: memref<32x32xbf16, #tpu.memory_space<vmem>>, %arg8: memref<32x64xbf16, #tpu.memory_space<vmem>>, %arg9: memref<64x32xbf16, #tpu.memory_space<vmem>>, %arg10: memref<8x32xbf16, #tpu.memory_space<vmem>>) attributes {dimension_semantics = [#tpu.dimension_semantics<parallel>], iteration_bounds = array<i64: 2>, scalar_prefetch = 0 : i64, scratch_operands = 0 : i64, tpu.core_type = #tpu.core_type<tc>, window_params = [{transform_indices = @transform_0, window_bounds = array<i64: 8, 8, 32>}, {transform_indices = @transform_1, window_bounds = array<i64: 8, 1, 8>}, {pipeline_mode = #tpu.pipeline_mode<synchronous>, transform_indices = @transform_2, window_bounds = array<i64: 8, 32>}, {pipeline_mode = #tpu.pipeline_mode<synchronous>, transform_indices = @transform_3, window_bounds = array<i64: 32, 32>}, {pipeline_mode = #tpu.pipeline_mode<synchronous>, transform_indices = @transform_4, window_bounds = array<i64: 32, 32>}, {pipeline_mode = #tpu.pipeline_mode<synchronous>, transform_indices = @transform_5, window_bounds = array<i64: 32, 32>}, {pipeline_mode = #tpu.pipeline_mode<synchronous>, transform_indices = @transform_6, window_bounds = array<i64: 32, 32>}, {pipeline_mode = #tpu.pipeline_mode<synchronous>, transform_indices = @transform_7, window_bounds = array<i64: 32, 64>}, {pipeline_mode = #tpu.pipeline_mode<synchronous>, transform_indices = @transform_8, window_bounds = array<i64: 64, 32>}, {transform_indices = @transform_9, window_bounds = array<i64: 8, 32>}]} {
    %c0 = arith.constant 0 : index
    %c0_0 = arith.constant 0 : index
    %c0_1 = arith.constant 0 : index
    %0 = vector.load %arg1[%c0, %c0_0, %c0_1] : memref<8x8x32xbf16, #tpu.memory_space<vmem>>, vector<8x8x32xbf16>
    %c0_2 = arith.constant 0 : index
    %c0_3 = arith.constant 0 : index
    %1 = vector.load %arg3[%c0_2, %c0_3] : memref<8x32xbf16, #tpu.memory_space<vmem>>, vector<8x32xbf16>
    %2 = vector.shape_cast %1 : vector<8x32xbf16> to vector<1x8x32xbf16>
    %3 = vector.broadcast %2 : vector<1x8x32xbf16> to vector<8x8x32xbf16>
    %4 = arith.addf %0, %3 : vector<8x8x32xbf16>
    %5 = vector.shape_cast %4 : vector<8x8x32xbf16> to vector<64x32xbf16>
    %c0_4 = arith.constant 0 : index
    %c0_5 = arith.constant 0 : index
    %6 = vector.load %arg5[%c0_4, %c0_5] : memref<32x32xbf16, #tpu.memory_space<vmem>>, vector<32x32xbf16>
    %cst = arith.constant dense<0.000000e+00> : vector<64x32xf32>
    %7 = tpu.matmul %5, %6, %cst {dimension_numbers = #tpu.dot_dimension_numbers<[1], [0], [0], [1], [0, 0, 1, 1], [], []>} : vector<64x32xbf16>, vector<32x32xbf16>, vector<64x32xf32> -> vector<64x32xf32>
    %c0_6 = arith.constant 0 : index
    %c0_7 = arith.constant 0 : index
    %8 = vector.load %arg6[%c0_6, %c0_7] : memref<32x32xbf16, #tpu.memory_space<vmem>>, vector<32x32xbf16>
    %cst_8 = arith.constant dense<0.000000e+00> : vector<64x32xf32>
    %9 = tpu.matmul %5, %8, %cst_8 {dimension_numbers = #tpu.dot_dimension_numbers<[1], [0], [0], [1], [0, 0, 1, 1], [], []>} : vector<64x32xbf16>, vector<32x32xbf16>, vector<64x32xf32> -> vector<64x32xf32>
    %10 = vector.shape_cast %7 : vector<64x32xf32> to vector<8x8x32xf32>
    %11 = arith.truncf %10 : vector<8x8x32xf32> to vector<8x8x32xbf16>
    %12 = vector.shape_cast %9 : vector<64x32xf32> to vector<8x8x32xf32>
    %13 = arith.truncf %12 : vector<8x8x32xf32> to vector<8x8x32xbf16>
    %14 = vector.extract_strided_slice %4 {offsets = [0, 0, 0], sizes = [8, 1, 32], strides = [1, 1, 1]} : vector<8x8x32xbf16> to vector<8x1x32xbf16>
    %15 = vector.shape_cast %14 : vector<8x1x32xbf16> to vector<8x32xbf16>
    %c0_9 = arith.constant 0 : index
    %c0_10 = arith.constant 0 : index
    %16 = vector.load %arg4[%c0_9, %c0_10] : memref<32x32xbf16, #tpu.memory_space<vmem>>, vector<32x32xbf16>
    %cst_11 = arith.constant dense<0.000000e+00> : vector<8x32xf32>
    %17 = tpu.matmul %15, %16, %cst_11 {dimension_numbers = #tpu.dot_dimension_numbers<[1], [0], [0], [1], [0, 0, 1, 1], [], []>} : vector<8x32xbf16>, vector<32x32xbf16>, vector<8x32xf32> -> vector<8x32xf32>
    %18 = vector.shape_cast %17 : vector<8x32xf32> to vector<8x1x32xf32>
    %19 = arith.truncf %18 : vector<8x1x32xf32> to vector<8x1x32xbf16>
    "tpu.trace_start"() <{level = 10 : i32, message = "bqd,bkd->bqk"}> : () -> ()
    %cst_12 = arith.constant dense<0.000000e+00> : vector<8x1x8xf32>
    %20 = tpu.matmul %19, %11, %cst_12 {dimension_numbers = #tpu.dot_dimension_numbers<[2], [2], [1], [1], [0, 0, 0, 1, 1, 1], [0], [0]>} : vector<8x1x32xbf16>, vector<8x8x32xbf16>, vector<8x1x8xf32> -> vector<8x1x8xf32>
    "tpu.trace_stop"() : () -> ()
    %c0_13 = arith.constant 0 : index
    %c0_14 = arith.constant 0 : index
    %c0_15 = arith.constant 0 : index
    %21 = vector.load %arg2[%c0_13, %c0_14, %c0_15] : memref<8x1x8xf32, #tpu.memory_space<vmem>>, vector<8x1x8xf32>
    %22 = arith.addf %20, %21 : vector<8x1x8xf32>
    %cst_16 = arith.constant dense<0xFF800000> : vector<8x1xf32>
    %23 = vector.multi_reduction <maximumf>, %22, %cst_16 [2] : vector<8x1x8xf32> to vector<8x1xf32>
    %24 = vector.shape_cast %23 : vector<8x1xf32> to vector<8x1x1xf32>
    %25 = vector.broadcast %24 : vector<8x1x1xf32> to vector<8x1x8xf32>
    %26 = arith.subf %22, %25 : vector<8x1x8xf32>
    %27 = math.exp %26 : vector<8x1x8xf32>
    %cst_17 = arith.constant dense<0.000000e+00> : vector<8x1xf32>
    %28 = vector.multi_reduction <add>, %27, %cst_17 [2] : vector<8x1x8xf32> to vector<8x1xf32>
    %29 = vector.shape_cast %28 : vector<8x1xf32> to vector<8x1x1xf32>
    %30 = tpu.reciprocal %29 {approx = true} : vector<8x1x1xf32> -> vector<8x1x1xf32>
    %31 = vector.broadcast %30 : vector<8x1x1xf32> to vector<8x1x8xf32>
    %32 = arith.mulf %27, %31 : vector<8x1x8xf32>
    %33 = arith.truncf %32 : vector<8x1x8xf32> to vector<8x1x8xbf16>
    "tpu.trace_start"() <{level = 10 : i32, message = "bqk,bkd->bqd"}> : () -> ()
    %cst_18 = arith.constant dense<0.000000e+00> : vector<8x1x32xf32>
    %34 = tpu.matmul %33, %13, %cst_18 {dimension_numbers = #tpu.dot_dimension_numbers<[2], [1], [1], [2], [0, 0, 0, 1, 1, 2], [0], [0]>} : vector<8x1x8xbf16>, vector<8x8x32xbf16>, vector<8x1x32xf32> -> vector<8x1x32xf32>
    "tpu.trace_stop"() : () -> ()
    %35 = vector.shape_cast %34 : vector<8x1x32xf32> to vector<8x32xf32>
    %36 = arith.extf %15 : vector<8x32xbf16> to vector<8x32xf32>
    %37 = arith.truncf %35 : vector<8x32xf32> to vector<8x32xbf16>
    %c0_19 = arith.constant 0 : index
    %c0_20 = arith.constant 0 : index
    %38 = vector.load %arg7[%c0_19, %c0_20] : memref<32x32xbf16, #tpu.memory_space<vmem>>, vector<32x32xbf16>
    %cst_21 = arith.constant dense<0.000000e+00> : vector<8x32xf32>
    %39 = tpu.matmul %37, %38, %cst_21 {dimension_numbers = #tpu.dot_dimension_numbers<[1], [0], [0], [1], [0, 0, 1, 1], [], []>} : vector<8x32xbf16>, vector<32x32xbf16>, vector<8x32xf32> -> vector<8x32xf32>
    %40 = arith.addf %36, %39 : vector<8x32xf32>
    %41 = arith.truncf %40 : vector<8x32xf32> to vector<8x32xbf16>
    %c0_22 = arith.constant 0 : index
    %c0_23 = arith.constant 0 : index
    %42 = vector.load %arg8[%c0_22, %c0_23] : memref<32x64xbf16, #tpu.memory_space<vmem>>, vector<32x64xbf16>
    %cst_24 = arith.constant dense<0.000000e+00> : vector<8x64xf32>
    %43 = tpu.matmul %41, %42, %cst_24 {dimension_numbers = #tpu.dot_dimension_numbers<[1], [0], [0], [1], [0, 0, 1, 1], [], []>} : vector<8x32xbf16>, vector<32x64xbf16>, vector<8x64xf32> -> vector<8x64xf32>
    %cst_25 = arith.constant 0.000000e+00 : f32
    %44 = vector.broadcast %cst_25 : f32 to vector<8x64xf32>
    %45 = arith.maximumf %43, %44 : vector<8x64xf32>
    %46 = arith.truncf %45 : vector<8x64xf32> to vector<8x64xbf16>
    %c0_26 = arith.constant 0 : index
    %c0_27 = arith.constant 0 : index
    %47 = vector.load %arg9[%c0_26, %c0_27] : memref<64x32xbf16, #tpu.memory_space<vmem>>, vector<64x32xbf16>
    %cst_28 = arith.constant dense<0.000000e+00> : vector<8x32xf32>
    %48 = tpu.matmul %46, %47, %cst_28 {dimension_numbers = #tpu.dot_dimension_numbers<[1], [0], [0], [1], [0, 0, 1, 1], [], []>} : vector<8x64xbf16>, vector<64x32xbf16>, vector<8x32xf32> -> vector<8x32xf32>
    %49 = arith.addf %40, %48 : vector<8x32xf32>
    %50 = arith.truncf %49 : vector<8x32xf32> to vector<8x32xbf16>
    %c0_29 = arith.constant 0 : index
    %c0_30 = arith.constant 0 : index
    %51 = vector.load %arg10[%c0_29, %c0_30] : memref<8x32xbf16, #tpu.memory_space<vmem>>, vector<8x32xbf16>
    tpu.vector_store %arg10[%c0_29, %c0_30], %50 {strides = array<i32>} : memref<8x32xbf16, #tpu.memory_space<vmem>>, vector<8x32xbf16>,
    return
  }
  func.func @transform_0(%arg0: i32) -> (i32, i32, i32) {
    %c0_i32 = arith.constant 0 : i32
    %c0_i32_0 = arith.constant 0 : i32
    %c0_i32_1 = arith.constant 0 : i32
    return %arg0, %c0_i32, %c0_i32_0 : i32, i32, i32
  }
  func.func @transform_1(%arg0: i32) -> (i32, i32, i32) {
    %c0_i32 = arith.constant 0 : i32
    %c0_i32_0 = arith.constant 0 : i32
    %c0_i32_1 = arith.constant 0 : i32
    return %arg0, %c0_i32, %c0_i32_0 : i32, i32, i32
  }
  func.func @transform_2(%arg0: i32) -> (i32, i32) {
    %c0_i32 = arith.constant 0 : i32
    %c0_i32_0 = arith.constant 0 : i32
    %c0_i32_1 = arith.constant 0 : i32
    return %c0_i32, %c0_i32_0 : i32, i32
  }
  func.func @transform_3(%arg0: i32) -> (i32, i32) {
    %c0_i32 = arith.constant 0 : i32
    %c0_i32_0 = arith.constant 0 : i32
    %c0_i32_1 = arith.constant 0 : i32
    return %c0_i32, %c0_i32_0 : i32, i32
  }
  func.func @transform_4(%arg0: i32) -> (i32, i32) {
    %c0_i32 = arith.constant 0 : i32
    %c0_i32_0 = arith.constant 0 : i32
    %c0_i32_1 = arith.constant 0 : i32
    return %c0_i32, %c0_i32_0 : i32, i32
  }
  func.func @transform_5(%arg0: i32) -> (i32, i32) {
    %c0_i32 = arith.constant 0 : i32
    %c0_i32_0 = arith.constant 0 : i32
    %c0_i32_1 = arith.constant 0 : i32
    return %c0_i32, %c0_i32_0 : i32, i32
  }
  func.func @transform_6(%arg0: i32) -> (i32, i32) {
    %c0_i32 = arith.constant 0 : i32
    %c0_i32_0 = arith.constant 0 : i32
    %c0_i32_1 = arith.constant 0 : i32
    return %c0_i32, %c0_i32_0 : i32, i32
  }
  func.func @transform_7(%arg0: i32) -> (i32, i32) {
    %c0_i32 = arith.constant 0 : i32
    %c0_i32_0 = arith.constant 0 : i32
    %c0_i32_1 = arith.constant 0 : i32
    return %c0_i32, %c0_i32_0 : i32, i32
  }
  func.func @transform_8(%arg0: i32) -> (i32, i32) {
    %c0_i32 = arith.constant 0 : i32
    %c0_i32_0 = arith.constant 0 : i32
    %c0_i32_1 = arith.constant 0 : i32
    return %c0_i32, %c0_i32_0 : i32, i32
  }
  func.func @transform_9(%arg0: i32) -> (i32, i32) {
    %c0_i32 = arith.constant 0 : i32
    %c0_i32_0 = arith.constant 0 : i32
    return %arg0, %c0_i32 : i32, i32
  }
}

</mosaic_0001>

<bundles_post_ra>
// kernel: tpu_custom_call.1
= control target key start
LH: loop header
LB: loop body
LE: loop exit
PB: predicated region body
PF: predicated region fallthrough
CT: control target
= control target key end

     0   :  { %14 = vsyncpa [#allocation3], 0  ;;  %s3347_s0 = inlined_call_operand.vmem [shape: bf16[16,8,32], index: 0, kind: input, shape index: {}]   ;;  %s3348_s1 = inlined_call_operand.vmem [shape: f32[16,1,8], index: 1, kind: input, shape index: {}]   ;;  %s3349_s2 = inlined_call_operand.hbm [shape: bf16[8,32], index: 2, kind: input, shape index: {}]   ;;  %s3350_s3 = inlined_call_operand.hbm [shape: bf16[32,32], index: 3, kind: input, shape index: {}]   ;;  %s3351_s4 = inlined_call_operand.hbm [shape: bf16[32,32], index: 4, kind: input, shape index: {}]   ;;  %s3352_s5 = inlined_call_operand.vmem [shape: bf16[32,32], index: 5, kind: input, shape index: {}]   ;;  %s3353_s6 = inlined_call_operand.hbm [shape: bf16[32,32], index: 6, kind: input, shape index: {}]   ;;  %s3354_s7 = inlined_call_operand.hbm [shape: bf16[32,64], index: 7, kind: input, shape index: {}]   ;;  %s3355_s8 = inlined_call_operand.vmem [shape: bf16[64,32], index: 8, kind: input, shape index: {}]   ;;  %s3356_s9 = inlined_call_operand.hbm [shape: bf16[16,32], index: 9, kind: output, shape index: {}]  }
   0x1   :  { %15 = vsyncpa [#allocation6], 0 }
   0x2   :  { %16 = vsyncpa [#allocation9], 0 }
   0x3   :  { %17 = vsyncpa [#allocation4], 0 }
   0x4   :  { %19 = vsyncpa [#allocation4 + $0x1], 0  ;;  %s2890_s30 = smov 0   ;;  %s2892_s10 = smov 0  }
   0x5   :  { %s2894_s11 = smov 0   ;;  %s2896_s12 = smov 0  }
   0x6 LB: > { %s2911_s13 = sadd.s32 4294967295, %s2827_s12   ;;  %s2178_s14 = sadd.s32 4294967294, %s2827_s12   ;;  %s2827_s12 = sphi %s2896_s12, %s3377_s12   ;;  %s2823_s11 = sphi %s2894_s11, %s3376_s11   ;;  %s2819_s10 = sphi %s2892_s10, %s3375_s10   ;;  %s2815_s30 = sphi %s2890_s30, %s3374_s30  }
   0x7   : > { %s2915_s15 = sadd.s32 1, %s2827_s12   ;;  %s231_s16 = sadd.s32 1, %s2823_s11 }
   0x8   : > { %s228_s17 = ssub.s32 %s2827_s12, %s2915_s15  ;;  %p241_p0 = scmp.ne.s32.totalorder %s2823_s11, %s2819_s10 }
   0x9   : > { %p229_p1 = scmp.eq.s32.totalorder %s228_s17, 0  ;;  %p242_p2 = scmp.eq.s32.totalorder %s2911_s13, 1 }
   0xa   : > { %p247_p3 = scmp.ne.s32.totalorder %s2819_s10, %s2815_s30  ;;  %p248_p4 = scmp.eq.s32.totalorder %s2178_s14, 1 }
   0xb   : > { %s2926_s18 = scalar_select %p229_p1, %s2823_s11, %s231_s16  }
   0xc   : > { %p2928_p5 = por %p242_p2, %p241_p0  ;;  %p2932_p6 = por %p248_p4, %p247_p3 }
   0xd   : > { %3360 = sst [smem:[#allocation16_spill]] %s2926_s18  ;;  %p2179_p7 = scmp.ge.s32.totalorder %s2827_s12, 1 }
   0xe   : > { %p255_p8 = scmp.lt.s32.totalorder %s2827_s12, 3  ;;  %p3357_p9 = scmp.eq.s32.totalorder %s2911_s13, 0 }
   0xf   : > { %s2829_s22 = smov [#allocation5]   ;;  %s2830_s25 = smov [#allocation8]  }
  0x10   : > { %p2939_p10 = pnand %p2179_p7, %p255_p8  ;;  %s278_s23 = sshll.u32 %s2829_s22, 4  ;;  %s279_s23 = int_to_ptr.vmem [resolvable:$true] %s278_s23 }
  0x11   : > { %s307_s26 = sshll.u32 %s2830_s25, 4  ;;  %s2831_s27 = smov [#allocation2]   ;;  %s308_s26 = int_to_ptr.vmem [resolvable:$true] %s307_s26 }
  0x12   : > { %p2506_p11 = pneg %p2939_p10  ;;  %s268_s28 = sshll.u32 %s2831_s27, 4  ;;  %s269_s28 = int_to_ptr.vmem [resolvable:$true] %s268_s28 }
  0x13   : > { %s2636_s14 = scalar_lea.vmem %s279_s23, 256  ;;  %p2644_p3 = scmp.lt.s32.totalorder %s279_s23, %s279_s23 }
  0x14   : > { %p2947_p12 = pnand %p3357_p9, %p2506_p11  ;;  %p2637_p0 = scmp.ne.s32.totalorder %s279_s23, %s2636_s14 }
  0x15   : > { %p2645_p4 = scmp.lt.s32.totalorder %s2636_s14, %s2636_s14 }
  0x16   : > { %p2953_p13 = pneg %p2947_p12 }
  0x17   : > { %p2646_p7 = por %p2645_p4, %p2644_p3 }
  0x18   : > { %p2639_p1 = pnand %p2637_p0, %p2953_p13 }
  0x1a   : > { %p2640_p2 = pneg %p2639_p1 }
  0x1c   : > { %p2647_p8 = pnand %p2646_p7, %p2640_p2 }
  0x1e   : > { %2650 = shalt.err (!%p2647_p8)
}
  0x1f   : > { %s3358_s16 = smov 64   ;;  %s2833_s17 = smov 4  }
  0x20   : > { %2512 = dma.hbm_to_vmem [thread:$0]  (!%p2947_p12), %s3350_s3, 256, %s279_s23, [#allocation6], %s3358_s16, %s3358_s16, %s2833_s17  }
  0x21   : > { %s2662_s27 = scalar_lea.vmem %s308_s26, 256  ;;  %p2670_p3 = scmp.lt.s32.totalorder %s308_s26, %s308_s26 }
  0x22   : > { %p2663_p11 = scmp.ne.s32.totalorder %s308_s26, %s2662_s27  ;;  %p2671_p2 = scmp.lt.s32.totalorder %s2662_s27, %s2662_s27 }
  0x24   : > { %p2665_p0 = pnand %p2663_p11, %p2953_p13  ;;  %p2672_p4 = por %p2671_p2, %p2670_p3 }
  0x26   : > { %p2666_p1 = pneg %p2665_p0 }
  0x28   : > { %p2673_p7 = pnand %p2672_p4, %p2666_p1 }
  0x2a   : > { %2676 = shalt.err (!%p2673_p7)
}
  0x2b   : > { %2518 = dma.hbm_to_vmem [thread:$0]  (!%p2947_p12), %s3353_s6, 256, %s308_s26, [#allocation9], %s3358_s16, %s3358_s16, %s2833_s17  }
  0x2c   : > { %s2688_s23 = scalar_lea.vmem %s269_s28, 64  ;;  %p2696_p9 = scmp.lt.s32.totalorder %s269_s28, %s269_s28 }
  0x2d   : > { %p2689_p8 = scmp.ne.s32.totalorder %s269_s28, %s2688_s23  ;;  %p2697_p3 = scmp.lt.s32.totalorder %s2688_s23, %s2688_s23 }
  0x2f   : > { %p2691_p11 = pnand %p2689_p8, %p2953_p13  ;;  %p2698_p1 = por %p2697_p3, %p2696_p9 }
  0x31   : > { %p2692_p0 = pneg %p2691_p11 }
  0x33   : > { %p2699_p2 = pnand %p2698_p1, %p2692_p0 }
  0x35   : > { %2702 = shalt.err (!%p2699_p2)
}
  0x36   : > { %2509 = dma.hbm_to_vmem [thread:$0]  (!%p2947_p12), %s3349_s2, 64, %s269_s28, [#allocation3]  }
  0x37   : > { %s2834_s18 = smov [#allocation7]   ;;  %s2835_s27 = smov [#allocation10]  }
  0x38   : > { %s291_s26 = sshll.u32 %s2834_s18, 4  ;;  %s320_s14 = sshll.u32 %s2835_s27, 4  ;;  %s292_s26 = int_to_ptr.vmem [resolvable:$true] %s291_s26  ;;  %s321_s14 = int_to_ptr.vmem [resolvable:$true] %s320_s14 }
  0x39   : > { %s2714_s16 = scalar_lea.vmem %s292_s26, 256  ;;  %p2722_p9 = scmp.lt.s32.totalorder %s292_s26, %s292_s26 }
  0x3a   : > { %p2715_p4 = scmp.ne.s32.totalorder %s292_s26, %s2714_s16  ;;  %p2723_p11 = scmp.lt.s32.totalorder %s2714_s16, %s2714_s16 }
  0x3c   : > { %p2717_p7 = pnand %p2715_p4, %p2953_p13  ;;  %p2724_p0 = por %p2723_p11, %p2722_p9 }
  0x3e   : > { %p2718_p8 = pneg %p2717_p7 }
  0x40   : > { %p2725_p3 = pnand %p2724_p0, %p2718_p8 }
  0x42   : > { %2728 = shalt.err (!%p2725_p3)
}
  0x43   : > { %s3366_s23 = smov 64   ;;  %s2740_s25 = scalar_lea.vmem %s321_s14, 256 }
  0x44   : > { %2515 = dma.hbm_to_vmem [thread:$0]  (!%p2947_p12), %s3351_s4, 256, %s292_s26, [#allocation6], %s3366_s23, %s3366_s23, %s2833_s17  }
  0x45   : > { %p2741_p1 = scmp.ne.s32.totalorder %s321_s14, %s2740_s25  ;;  %p2748_p7 = scmp.lt.s32.totalorder %s321_s14, %s321_s14 }
  0x46   : > { %p2749_p9 = scmp.lt.s32.totalorder %s2740_s25, %s2740_s25 }
  0x47   : > { %p2743_p2 = pnand %p2741_p1, %p2953_p13 }
  0x48   : > { %p2750_p8 = por %p2749_p9, %p2748_p7 }
  0x49   : > { %p2744_p4 = pneg %p2743_p2 }
  0x4b   : > { %p2751_p11 = pnand %p2750_p8, %p2744_p4 }
  0x4d   : > { %2754 = shalt.err (!%p2751_p11)
}
  0x4e   : > { %2521 = dma.hbm_to_vmem [thread:$0]  (!%p2947_p12), %s3354_s7, 256, %s321_s14, [#allocation9], %s3366_s23, %s3366_s23, %s2833_s17  }
  0x4f   : > { %356 = sbr.rel (%p2939_p10) target bundleno = 1692 (0x69c), region = 56  ;;  %p3367_p13 = scmp.eq.s32.totalorder (!%p2939_p10), %s2911_s13, 0 }
  0x54   : > { %2798 = dma.done.wait (%p3367_p13), [#allocation3], 64   ;;  %p3368_p0 = pmov %p3367_p13 }
  0x56   : > { %2800 = vsyncadd (%p3368_p0), [#allocation3], 4294967232  ;;  %p3369_p3 = pmov %p3368_p0 }
  0x57   : > { %p3370_p1 = pmov %p3368_p0 }
  0x58   : > { %2802 = dma.done.wait (%p3369_p3), [#allocation6], 512  }
  0x59   : > { %2804 = vsyncadd (%p3370_p1), [#allocation6], 4294966784  ;;  %p3371_p2 = pmov %p3368_p0 }
  0x5a   : > { %p3372_p12 = pmov %p3368_p0 }
  0x5b   : > { %2806 = dma.done.wait (%p3371_p2), [#allocation9], 512  }
  0x5c   : > { %2808 = vsyncadd (%p3372_p12), [#allocation9], 4294966784  ;;  %s2193_s21 = sshll.u32 %s2911_s13, 3  ;;  %vm477_vm0 = vcmask 261120   ;;  %v2579_v0 = vld [vmem:[#allocation7 + $0x8] sm:$0xff]   ;;  %vm673_vm1 = vcmask 1041409  }
  0x5d   : > { %p413_p10 = scmp.lt.s32.totalorder %s2193_s21, 15  ;;  %v2580_v1 = vld [vmem:[#allocation7] sm:$0xff]   ;;  %vm676_vm2 = vcmask 1042434   ;;  %2328 = vmatprep.subr.bf16.mxu0 %v2579_v0  ;;  %v432_v4 = vld [vmem:[#allocation2] sm:$0xf]  ;;  %vm679_vm3 = vcmask 1043459  }
  0x5e   : > { %2329 = vmatpush3.bf16.msra.mxu0 %v2579_v0  ;;  %v2581_v14 = vld [vmem:[#allocation5 + $0x8] sm:$0xff]   ;;  %vm682_vm4 = vcmask 1044484   ;;  %v2836_v27 = vmov 0.0   ;;  %v2584_v30 = vld [vmem:[%s3352_s5] sm:$0xff]   ;;  %vm685_vm5 = vcmask 1045509   ;;  %vm688_vm6 = vcmask 1046534  }
  0x5f   : > { %s3379_s21 = smov (!%p413_p10, %s2193_s21), 15  ;;  %2330 = vmatprep.subr.bf16.mxu0 %v2580_v1  ;;  %v2583_v24 = vld [vmem:[%s3352_s5 + $0x8] sm:$0xff]   ;;  %vm691_vm7 = vcmask 1047559   ;;  %vm2837_vm8 = vmmov 0   ;;  %v2838_v0 = vmov 1966171168  }
  0x60   : > { %s2194_s24 = sshll.u32 %s3379_s21, 2  ;;  %v2582_v34 = vld [vmem:[#allocation5] sm:$0xff]   ;;  %2340 = vmatprep.subr.bf16.mxu1 %v2583_v24  ;;  %vm1292_vm9 = vcmask 1043456   ;;  %s3176_s16 = scalar_lea.vmem %s3348_s1, %s3379_s21  ;;  %vm1191_vm10 = vcmask 57344   ;;  %vm1288_vm11 = vcmask 64512   ;;  %vm1920_vm12 = vcmask 523264  }
  0x61   : > { %s416_s26 = scalar_lea.vmem %s3347_s0, %s2194_s24  ;;  %2341 = vmatpush3.bf16.msra.mxu1 %v2583_v24  ;;  %s409_s23 = sand.u32 1, %s2819_s10   ;;  %vm2044_vm13 = vcmask 257024  }
  0x62   : > { %v424_v2 = vld [vmem:[%s416_s26] sm:$0xf]  ;;  %v425_v3 = vld [vmem:[%s416_s26 + $0x4] sm:$0xf]  ;;  %v426_v7 = vld [vmem:[%s416_s26 + $0x8] sm:$0xf]  ;;  %2331 = vmatpush3.bf16.msra.mxu0 %v2580_v1  ;;  %2342 = vmatprep.subr.bf16.mxu1 %v2584_v30  ;;  %v752_v1 = vunpack.c.l.s4 %v2838_v0 }
  0x63   : > { %v3025_v5 = vadd.bf16 %v432_v4, %v424_v2  ;;  %v3027_v6 = vadd.bf16 %v432_v4, %v425_v3  ;;  %v427_v8 = vld [vmem:[%s416_s26 + $0xc] sm:$0xf]  ;;  %v3029_v9 = vadd.bf16 %v432_v4, %v426_v7  ;;  %v428_v15 = vld [vmem:[%s416_s26 + $0x10] sm:$0xf]  ;;  %v429_v16 = vld [vmem:[%s416_s26 + $0x14] sm:$0xf]  ;;  %2352 = vmatprep.subr.bf16.mxu0 %v2836_v27  ;;  %v754_v2 = vlaneseq }
  0x64   : > { %v3031_v10 = vadd.bf16 %v432_v4, %v427_v8  ;;  %v430_v17 = vld [vmem:[%s416_s26 + $0x18] sm:$0xf]  ;;  %v431_v21 = vld [vmem:[%s416_s26 + $0x1c] sm:$0xf]  ;;  %v3050_v28 = vadd.bf16 %v432_v4, %v428_v15  ;;  %v3052_v29 = vadd.bf16 %v432_v4, %v429_v16  ;;  %s2192_s28 = sshll.u32 %s409_s23, 2  ;;  %s2259_s22 = sshll.u32 %s2911_s13, 6 }
  0x65   : > { %v2196_v11 = vcombine.low %v3025_v5, %v3027_v6  ;;  %v2212_v12 = vcombine.low %v3025_v5, %v3025_v5  ;;  %v2213_v13 = vcombine.low %v3027_v6, %v3027_v6  ;;  %v2214_v19 = vcombine.low %v3029_v9, %v3029_v9  ;;  %2343 = vmatpush3.bf16.msra.mxu1 %v2584_v30  ;;  %s411_s25 = scalar_lea.vmem [#allocation11], %s2192_s28  ;;  %s2058_s24 = scalar_lea.hbm %s3356_s9, %s2259_s22 }
  0x66   : > { %v2197_v18 = vcombine.low %v3029_v9, %v3031_v10  ;;  %v2215_v20 = vcombine.low %v3031_v10, %v3031_v10  ;;  %v3058_v32 = vadd.bf16 %v432_v4, %v430_v17  ;;  %v3060_v33 = vadd.bf16 %v432_v4, %v431_v21  ;;  %2360 = vmatprep.subr.bf16.mxu1 %v2836_v27  ;;  %s2047_s29 = scalar_lea.sflag [#allocation4], %s409_s23  ;;  %s2839_s13 = smov [#allocation11]  }
  0x67   : > { %2332 = vmatprep.mubr.msk.bf16.mxu0 %vm477_vm0, %v2196_v11  ;;  %v664_v22 = vunpack.c.l.b16 %v2212_v12  ;;  %v665_v23 = vunpack.c.l.b16 %v2213_v13  ;;  %v666_v25 = vunpack.c.l.b16 %v2214_v19  ;;  %2344 = vmatprep.mubr.msk.bf16.mxu1 %vm477_vm0, %v2196_v11  ;;  %v2198_v37 = vcombine.low %v3050_v28, %v3052_v29  ;;  %s2759_s26 = sshll.u32 %s2839_s13, 4  ;;  %s2760_s26 = int_to_ptr.vmem [resolvable:$false] %s2759_s26 }
  0x68   : > { %v667_v26 = vunpack.c.l.b16 %v2215_v20  ;;  %2333 = vmatmul.mubr.msk.bf16.vlgmr.msra.gmra.mxu0 %vm477_vm0, %v2197_v18  ;;  %v2216_v38 = vcombine.low %v3050_v28, %v3050_v28  ;;  %v2217_v40 = vcombine.low %v3052_v29, %v3052_v29  ;;  %v2218_v43 = vcombine.low %v3058_v32, %v3058_v32  ;;  %2345 = vmatmul.mubr.msk.bf16.vlgmr.msra.gmra.mxu1 %vm477_vm0, %v2197_v18  ;;  %s2761_s27 = scalar_lea.vmem %s2760_s26, 128 }
  0x69   : > { %v672_v31 = vrot.slane %v665_v23, 7  ;;  %v675_v35 = vrot.slane %v666_v25, 6  ;;  %2353 = vmatpush3.bf16.msra.mxu0 %v2581_v14  ;;  %2336 = vmatprep.mubr.msk.bf16.mxu0 %vm477_vm0, %v2198_v37  ;;  %v2219_v46 = vcombine.low %v3060_v33, %v3060_v33  ;;  %v2199_v48 = vcombine.low %v3058_v32, %v3060_v33 }
  0x6a   : > { %v678_v36 = vrot.slane %v667_v26, 5  ;;  %v668_v42 = vunpack.c.l.b16 %v2216_v38  ;;  %2354 = vmatprep.subr.bf16.mxu0 %v2836_v27  ;;  %v669_v45 = vunpack.c.l.b16 %v2217_v40  ;;  %v670_v49 = vunpack.c.l.b16 %v2218_v43  ;;  %2348 = vmatprep.mubr.msk.bf16.mxu1 %vm477_vm0, %v2198_v37 }
  0x6b   : > { %v674_v39 = vsel %vm673_vm1, %v672_v31, %v664_v22  ;;  %v671_v51 = vunpack.c.l.b16 %v2219_v46  ;;  %v753_v13 = vunpack.c.0.s8 %v752_v1  ;;  %v755_v14 = vshrl.u32 %v754_v2, 7 }
  0x6c   : > { %v677_v41 = vsel %vm676_vm2, %v675_v35, %v674_v39  ;;  %v681_v47 = vrot.slane %v668_v42, 4  ;;  %v684_v50 = vrot.slane %v669_v45, 3  ;;  %v687_v53 = vrot.slane %v670_v49, 2 }
  0x6d   : > { %v680_v44 = vsel %vm679_vm3, %v678_v36, %v677_v41  ;;  %2355 = vmatpush3.bf16.msra.mxu0 %v2582_v34  ;;  %v690_v55 = vrot.slane %v671_v51, 1  ;;  %v756_v21 = vsub.s32 %v753_v13, %v755_v14 }
  0x6e   : > { %v683_v52 = vsel %vm682_vm4, %v681_v47, %v680_v44  ;;  %2366 = vmatprep.subr.bf16.mxu0 %v2836_v27 }
  0x6f   : > { %v686_v54 = vsel %vm685_vm5, %v684_v50, %v683_v52 }
  0x70   : > { %2337 = vmatmul.mubr.msk.bf16.gmra.mxu0 %vm477_vm0, %v2199_v48  ;;  %v689_v56 = vsel %vm688_vm6, %v687_v53, %v686_v54  ;;  %2349 = vmatmul.mubr.msk.bf16.gmra.mxu1 %vm477_vm0, %v2199_v48 }
  0x71   : > { %2356 = vmatprep.mubr.msk.bf16.mxu0 %vm2837_vm8, %v2836_v27  ;;  %v692_v57 = vsel %vm691_vm7, %v690_v55, %v689_v56  ;;  %2362 = vmatprep.mubr.msk.bf16.mxu1 %vm2837_vm8, %v2836_v27 }
  0x72   : > { %v693_v58 = vpack.c.b16 %v692_v57, %v692_v57 }
  0x78   : > { %2357 = vmatmul.mubr.msk.bf16.vlgmr.msra.gmra.mxu0 %vm477_vm0, %v693_v58 }
  0x79   : > { %2368 = vmatprep.mubr.msk.bf16.mxu0 %vm2837_vm8, %v2836_v27 }
 0x128   : > { %v2334_v59 = vpop.f32.mrf.mxu0  ;;  %v2346_v7 = vpop.f32.mrf.mxu1 }
 0x129   : > { %v646_v11 = vpack.c.bf16 %v2346_v7, %v2346_v7  ;;  %v638_v41 = vpack.c.bf16 %v2334_v59, %v2334_v59 }
 0x12a   : > { %v524_v60 = vpop.f32.mrf.mxu0  ;;  %v3102_v15 = vpop.f32.mrf.mxu1 }
 0x12b   : > { %v636_v61 = vpack.c.bf16 %v524_v60, %v524_v60  ;;  %v3105_v17 = vsel %vm1292_vm9, %v646_v11, 0  ;;  %v919_v51 = vsel %vm477_vm0, %v638_v41, 0  ;;  %v817_v41 = vld [vmem:[%s3176_s16 + $0x2] sm:$0x1] }
 0x12c   : > { %v2335_v62 = vpop.f32.mrf.mxu0  ;;  %v2347_v18 = vpop.f32.mrf.mxu1 }
 0x12d   : > { %v827_v63 = vsel %vm477_vm0, %v636_v61, 0  ;;  %v647_v20 = vpack.c.bf16 %v2347_v18, %v2347_v18  ;;  %v639_v46 = vpack.c.bf16 %v2335_v62, %v2335_v62 }
 0x12e   : > { %v527_v3 = vpop.f32.mrf.mxu0  ;;  %2361 = vmatpush3.bf16.xpose.msra.mxu1 %v827_v63  ;;  %v3110_v22 = vpop.f32.mrf.mxu1 }
 0x12f   : > { %v637_v4 = vpack.c.bf16 %v527_v3, %v527_v3  ;;  %2372 = vmatprep.subr.bf16.mxu1 %v2836_v27  ;;  %v3113_v24 = vsel %vm1292_vm9, %v647_v20, 0  ;;  %v965_v53 = vsel %vm477_vm0, %v639_v46, 0  ;;  %v818_v46 = vld [vmem:[%s3176_s16 + $0x3] sm:$0x1] }
 0x130   : > { %v3099_v8 = vpop.f32.mrf.mxu0  ;;  %v2350_v25 = vpop.f32.mrf.mxu1 }
 0x131   : > { %v873_v12 = vsel %vm477_vm0, %v637_v4, 0  ;;  %v650_v30 = vpack.c.bf16 %v2350_v25, %v2350_v25  ;;  %v642_v1 = vpack.c.bf16 %v3099_v8, %v3099_v8  ;;  %v644_v8 = vpack.c.bf16 %v3102_v15, %v3102_v15  ;;  %v816_v25 = vld [vmem:[%s3176_s16 + $0x1] sm:$0x1] }
 0x132   : > { %v540_v16 = vpop.f32.mrf.mxu0  ;;  %2367 = vmatpush3.bf16.xpose.msra.mxu0 %v873_v12  ;;  %v621_v34 = vpop.f32.mrf.mxu1 }
 0x133   : > { %2378 = vmatprep.subr.bf16.mxu0 %v2836_v27  ;;  %v3116_v36 = vsel %vm1292_vm9, %v650_v30, 0  ;;  %v648_v37 = vpack.c.bf16 %v621_v34, %v621_v34  ;;  %v640_v55 = vpack.c.bf16 %v540_v16, %v540_v16  ;;  %v1103_v7 = vsel %vm477_vm0, %v642_v1, 0 }
 0x134   : > { %v3108_v19 = vpop.f32.mrf.mxu0  ;;  %v2351_v40 = vpop.f32.mrf.mxu1  ;;  %v645_v16 = vpack.c.bf16 %v3110_v22, %v3110_v22  ;;  %v815_v22 = vld [vmem:[%s3176_s16] sm:$0x1] }
 0x135   : > { %v3119_v43 = vsel %vm1292_vm9, %v648_v37, 0  ;;  %v651_v44 = vpack.c.bf16 %v2351_v40, %v2351_v40  ;;  %v1011_v60 = vsel %vm477_vm0, %v640_v55, 0  ;;  %v643_v3 = vpack.c.bf16 %v3108_v19, %v3108_v19 }
 0x136   : > { %v543_v23 = vpop.f32.mrf.mxu0  ;;  %v1294_v19 = vsel %vm1292_vm9, %v644_v8, 0  ;;  %v1340_v15 = vsel %vm1292_vm9, %v645_v16, 0  ;;  %v822_v16 = vld [vmem:[%s3176_s16 + $0x7] sm:$0x1] }
 0x137   : > { %v3122_v49 = vsel %vm1292_vm9, %v651_v44, 0  ;;  %v641_v58 = vpack.c.bf16 %v543_v23, %v543_v23  ;;  %v1149_v12 = vsel %vm477_vm0, %v643_v3, 0 }
 0x138   : > { %v743_v26 = vpop.f32.mrf.mxu0 }
 0x139   : > { %v757_v31 = vrot.slane %v743_v26, %v756_v21  ;;  %v750_v52 = vcombine.high %v743_v26, %v743_v26  ;;  %v1057_v63 = vsel %vm477_vm0, %v641_v58, 0 }
 0x13a   : > { %v2358_v35 = vpop.f32.mrf.mxu0 }
 0x13b   : > { %v765_v38 = vcombine.high %v757_v31, %v757_v31  ;;  %v773_v39 = vrot.slane %v757_v31, %v756_v21  ;;  %v764_v56 = vrot.slane %v750_v52, %v756_v21 }
 0x13c   : > { %v746_v42 = vpop.f32.mrf.mxu0 }
 0x13d   : > { %v787_v45 = vrot.slane %v765_v38, %v756_v21  ;;  %v807_v47 = vpack.c.bf16 %v773_v39, %v773_v39  ;;  %v795_v54 = vcombine.high %v773_v39, %v773_v39  ;;  %v766_v61 = vcombine.high %v764_v56, %v764_v56 }
 0x13e   : > { %v2359_v48 = vpop.f32.mrf.mxu0  ;;  %v780_v0 = vrot.slane %v764_v56, %v756_v21 }
 0x13f   : > { %v808_v50 = vpack.c.bf16 %v787_v45, %v787_v45  ;;  %2363 = vmatmul.mubr.msk.bf16.vlgmr.msra.gmra.mxu1 %vm477_vm0, %v807_v47  ;;  %v797_v57 = vcombine.high %v787_v45, %v787_v45  ;;  %v809_v59 = vpack.c.bf16 %v795_v54, %v795_v54  ;;  %v794_v2 = vrot.slane %v766_v61, %v756_v21  ;;  %v3178_v21 = vpop.f32.mrf.mxu1  ;;  %v820_v61 = vld [vmem:[%s3176_s16 + $0x5] sm:$0x1] }
 0x140   : > { %2373 = vmatpush3.bf16.xpose.msra.mxu1 %v919_v51  ;;  %2374 = vmatprep.mubr.msk.bf16.mxu1 %vm2837_vm8, %v2836_v27  ;;  %v811_v4 = vpack.c.bf16 %v780_v0, %v780_v0  ;;  %v796_v13 = vcombine.high %v780_v0, %v780_v0 }
 0x141   : > { %2369 = vmatmul.mubr.msk.bf16.vlgmr.msra.gmra.mxu0 %vm477_vm0, %v808_v50  ;;  %2384 = vmatprep.subr.bf16.mxu1 %v2836_v27  ;;  %v810_v62 = vpack.c.bf16 %v797_v57, %v797_v57  ;;  %v812_v11 = vpack.c.bf16 %v794_v2, %v794_v2  ;;  %v798_v14 = vcombine.high %v794_v2, %v794_v2  ;;  %v819_v57 = vld [vmem:[%s3176_s16 + $0x4] sm:$0x1] }
 0x142   : > { %2379 = vmatpush3.bf16.xpose.msra.mxu0 %v965_v53  ;;  %2380 = vmatprep.mubr.msk.bf16.mxu0 %vm2837_vm8, %v2836_v27  ;;  %v813_v18 = vpack.c.bf16 %v796_v13, %v796_v13  ;;  %v821_v13 = vld [vmem:[%s3176_s16 + $0x6] sm:$0x1]  ;;  %s2060_s16 = sshll.u32 %s411_s25, 4  ;;  %s2061_s16 = int_to_ptr.vmem [resolvable:$true] %s2060_s16 }
 0x143   : > { %2390 = vmatprep.subr.bf16.mxu0 %v2836_v27  ;;  %v814_v20 = vpack.c.bf16 %v798_v14, %v798_v14  ;;  %s2755_s17 = scalar_lea.vmem %s2061_s16, 64  ;;  %p2762_p8 = scmp.lt.s32.totalorder %s2061_s16, %s2760_s26 }
 0x144   : > { %p2756_p4 = scmp.ne.s32.totalorder %s2061_s16, %s2755_s17  ;;  %p2763_p11 = scmp.lt.s32.totalorder %s2761_s27, %s2755_s17 }
 0x146   : > { %p2757_p7 = pnand %p2756_p4, %p2928_p5  ;;  %p2764_p13 = por %p2763_p11, %p2762_p8 }
 0x147   : > { %2375 = vmatmul.mubr.msk.bf16.vlgmr.msra.gmra.mxu1 %vm477_vm0, %v809_v59 }
 0x148   : > { %2385 = vmatpush3.bf16.xpose.msra.mxu1 %v1011_v60  ;;  %2386 = vmatprep.mubr.msk.bf16.mxu1 %vm2837_vm8, %v2836_v27  ;;  %p2758_p9 = pneg %p2757_p7 }
 0x149   : > { %2381 = vmatmul.mubr.msk.bf16.vlgmr.msra.gmra.mxu0 %vm477_vm0, %v810_v62  ;;  %2396 = vmatprep.subr.bf16.mxu1 %v2836_v27 }
 0x14a   : > { %2391 = vmatpush3.bf16.xpose.msra.mxu0 %v1057_v63  ;;  %2392 = vmatprep.mubr.msk.bf16.mxu0 %vm2837_vm8, %v2836_v27  ;;  %p2765_p0 = pnand %p2764_p13, %p2758_p9 }
 0x14b   : > { %2402 = vmatprep.subr.bf16.mxu0 %v2836_v27 }
 0x14f   : > { %2387 = vmatmul.mubr.msk.bf16.vlgmr.msra.gmra.mxu1 %vm477_vm0, %v811_v4 }
 0x150   : > { %2397 = vmatpush3.bf16.xpose.msra.mxu1 %v1103_v7  ;;  %2398 = vmatprep.mubr.msk.bf16.mxu1 %vm2837_vm8, %v2836_v27 }
 0x151   : > { %2393 = vmatmul.mubr.msk.bf16.vlgmr.msra.gmra.mxu0 %vm477_vm0, %v812_v11  ;;  %2408 = vmatprep.subr.bf16.mxu1 %v2836_v27 }
 0x152   : > { %2403 = vmatpush3.bf16.xpose.msra.mxu0 %v1149_v12  ;;  %2404 = vmatprep.mubr.msk.bf16.mxu0 %vm2837_vm8, %v2836_v27 }
 0x153   : > { %2414 = vmatprep.subr.bf16.mxu0 %v2836_v27 }
 0x157   : > { %2399 = vmatmul.mubr.msk.bf16.vlgmr.msra.gmra.mxu1 %vm477_vm0, %v813_v18 }
 0x158   : > { %2409 = vmatpush3.bf16.msra.mxu1 %v1294_v19  ;;  %2410 = vmatprep.mubr.msk.bf16.mxu1 %vm2837_vm8, %v2836_v27 }
 0x159   : > { %2405 = vmatmul.mubr.msk.bf16.vlgmr.msra.gmra.mxu0 %vm477_vm0, %v814_v20  ;;  %2420 = vmatprep.subr.bf16.mxu1 %v2836_v27 }
 0x15a   : > { %2415 = vmatpush3.bf16.msra.mxu0 %v1340_v15  ;;  %2416 = vmatprep.mubr.msk.bf16.mxu0 %vm2837_vm8, %v2836_v27 }
 0x15b   : > { %2426 = vmatprep.subr.bf16.mxu0 %v2836_v27 }
 0x1ff   : > { %v863_v23 = vpop.f32.mrf.mxu1 }
 0x200   : > { %v3182_v26 = vadd.f32 %v863_v23, %v815_v22 }
 0x201   : > { %v2364_v30 = vpop.f32.mrf.mxu1  ;;  %v909_v31 = vpop.f32.mrf.mxu0 }
 0x202   : > { %v3184_v34 = vadd.f32 %v909_v31, %v816_v25  ;;  %v1192_v35 = vsel %vm1191_vm10, %v3182_v26, -inf }
 0x203   : > { %1193 = vmax.xlane.f32.xlu0 %v1192_v35  ;;  %v866_v37 = vpop.f32.mrf.mxu1  ;;  %v2370_v38 = vpop.f32.mrf.mxu0 }
 0x204   : > { %v1195_v42 = vsel %vm1191_vm10, %v3184_v34, -inf }
 0x205   : > { %v2365_v39 = vpop.f32.mrf.mxu1  ;;  %v912_v40 = vpop.f32.mrf.mxu0 }
 0x207   : > { %v955_v44 = vpop.f32.mrf.mxu1  ;;  %1196 = vmax.xlane.f32.xlu0 %v1195_v42  ;;  %v2371_v45 = vpop.f32.mrf.mxu0 }
 0x208   : > { %v956_v47 = vadd.f32 %v955_v44, %v817_v41 }
 0x209   : > { %v2376_v48 = vpop.f32.mrf.mxu1  ;;  %v1001_v50 = vpop.f32.mrf.mxu0 }
 0x20a   : > { %v1002_v51 = vadd.f32 %v1001_v50, %v818_v46  ;;  %v1198_v52 = vsel %vm1191_vm10, %v956_v47, -inf }
 0x20b   : > { %1199 = vmax.xlane.f32.xlu1 %v1198_v52  ;;  %v958_v53 = vpop.f32.mrf.mxu1  ;;  %v2382_v54 = vpop.f32.mrf.mxu0 }
 0x20c   : > { %v1201_v58 = vsel %vm1191_vm10, %v1002_v51, -inf }
 0x20d   : > { %v2377_v55 = vpop.f32.mrf.mxu1  ;;  %v1004_v56 = vpop.f32.mrf.mxu0 }
 0x20f   : > { %v1047_v59 = vpop.f32.mrf.mxu1  ;;  %1202 = vmax.xlane.f32.xlu1 %v1201_v58  ;;  %v2383_v60 = vpop.f32.mrf.mxu0 }
 0x210   : > { %v1048_v62 = vadd.f32 %v1047_v59, %v819_v57 }
 0x211   : > { %v2388_v63 = vpop.f32.mrf.mxu1  ;;  %v1093_v0 = vpop.f32.mrf.mxu0 }
 0x212   : > { %v1094_v1 = vadd.f32 %v1093_v0, %v820_v61  ;;  %v1204_v2 = vsel %vm1191_vm10, %v1048_v62, -inf }
 0x213   : > { %v1050_v3 = vpop.f32.mrf.mxu1  ;;  %1205 = vmax.xlane.f32.xlu0 %v1204_v2  ;;  %v2394_v4 = vpop.f32.mrf.mxu0 }
 0x214   : > { %v1207_v7 = vsel %vm1191_vm10, %v1094_v1, -inf }
 0x215   : > { %v2389_v11 = vpop.f32.mrf.mxu1  ;;  %1208 = vmax.xlane.f32.xlu1 %v1207_v7  ;;  %v1096_v12 = vpop.f32.mrf.mxu0 }
 0x217   : > { %v2395_v8 = vpop.f32.mrf.mxu0  ;;  %v1139_v14 = vpop.f32.mrf.mxu1 }
 0x218   : > { %v1140_v18 = vadd.f32 %v1139_v14, %v821_v13 }
 0x219   : > { %v2400_v19 = vpop.f32.mrf.mxu1  ;;  %v1185_v20 = vpop.f32.mrf.mxu0 }
 0x21a   : > { %v1186_v15 = vadd.f32 %v1185_v20, %v822_v16  ;;  %v1210_v22 = vsel %vm1191_vm10, %v1140_v18, -inf }
 0x21b   : > { %v1142_v23 = vpop.f32.mrf.mxu1  ;;  %1211 = vmax.xlane.f32.xlu0 %v1210_v22  ;;  %v2406_v25 = vpop.f32.mrf.mxu0 }
 0x21c   : > { %v1213_v30 = vsel %vm1191_vm10, %v1186_v15, -inf }
 0x21d   : > { %v2401_v31 = vpop.f32.mrf.mxu1  ;;  %1214 = vmax.xlane.f32.xlu1 %v1213_v30  ;;  %v1188_v35 = vpop.f32.mrf.mxu0 }
 0x21f   : > { %v2407_v37 = vpop.f32.mrf.mxu0 }
 0x28c   : > { %v1194_v38 = vpop.xlane.xlu0 %1193 }
 0x28d   : > { %v1216_v39 = vsub.f32 %v3182_v26, %v1194_v38 }
 0x28f   : > { %v1224_v40 = vmul.f32 1.442695, %v1216_v39 }
 0x290   : > { %v1197_v41 = vpop.xlane.xlu0 %1196 }
 0x291   : > { %2593 = vpow2.f32 %v1224_v40  ;;  %v1217_v42 = vsub.f32 %v3184_v34, %v1197_v41 }
 0x293   : > { %v1226_v44 = vmul.f32 1.442695, %v1217_v42 }
 0x294   : > { %v1200_v45 = vpop.xlane.xlu1 %1199 }
 0x295   : > { %2595 = vpow2.f32 %v1226_v44  ;;  %v1218_v46 = vsub.f32 %v956_v47, %v1200_v45 }
 0x297   : > { %v1228_v48 = vmul.f32 1.442695, %v1218_v46 }
 0x298   : > { %v1203_v50 = vpop.xlane.xlu1 %1202 }
 0x299   : > { %2597 = vpow2.f32 %v1228_v48  ;;  %v1219_v52 = vsub.f32 %v1002_v51, %v1203_v50  ;;  %v649_v48 = vpack.c.bf16 %v3178_v21, %v3178_v21 }
 0x29b   : > { %v1230_v53 = vmul.f32 1.442695, %v1219_v52 }
 0x29c   : > { %v1206_v54 = vpop.xlane.xlu0 %1205 }
 0x29d   : > { %2599 = vpow2.f32 %v1230_v53  ;;  %v1220_v55 = vsub.f32 %v1048_v62, %v1206_v54  ;;  %v1524_v53 = vsel %vm1292_vm9, %v649_v48, 0 }
 0x29e   : > { %v2594_v56 = vpop.eup %2593  ;;  %v1209_v57 = vpop.xlane.xlu1 %1208 }
 0x29f   : > { %v1232_v26 = vmul.f32 1.442695, %v1220_v55  ;;  %v1221_v58 = vsub.f32 %v1094_v1, %v1209_v57  ;;  %v1240_v59 = vsel %vm1191_vm10, %v2594_v56, 0.0 }
 0x2a0   : > { %1241 = vadd.xlane.f32.xlu0 %v1240_v59 }
 0x2a1   : > { %2601 = vpow2.f32 %v1232_v26  ;;  %v1234_v34 = vmul.f32 1.442695, %v1221_v58 }
 0x2a2   : > { %v2596_v60 = vpop.eup %2595 }
 0x2a3   : > { %2603 = vpow2.f32 %v1234_v34  ;;  %v1243_v47 = vsel %vm1191_vm10, %v2596_v60, 0.0 }
 0x2a4   : > { %v1212_v61 = vpop.xlane.xlu0 %1211  ;;  %1244 = vadd.xlane.f32.xlu1 %v1243_v47 }
 0x2a5   : > { %v1222_v51 = vsub.f32 %v1140_v18, %v1212_v61 }
 0x2a6   : > { %v2598_v63 = vpop.eup %2597  ;;  %v1215_v0 = vpop.xlane.xlu1 %1214 }
 0x2a7   : > { %v1236_v2 = vmul.f32 1.442695, %v1222_v51  ;;  %v1223_v62 = vsub.f32 %v1186_v15, %v1215_v0  ;;  %v1246_v3 = vsel %vm1191_vm10, %v2598_v63, 0.0 }
 0x2a8   : > { %1247 = vadd.xlane.f32.xlu0 %v1246_v3 }
 0x2a9   : > { %2605 = vpow2.f32 %v1236_v2  ;;  %v1238_v1 = vmul.f32 1.442695, %v1223_v62 }
 0x2aa   : > { %v2600_v4 = vpop.eup %2599 }
 0x2ab   : > { %2607 = vpow2.f32 %v1238_v1  ;;  %v1249_v7 = vsel %vm1191_vm10, %v2600_v4, 0.0 }
 0x2ac   : > { %1250 = vadd.xlane.f32.xlu1 %v1249_v7 }
 0x2ae   : > { %v2602_v11 = vpop.eup %2601 }
 0x2af   : > { %v1252_v12 = vsel %vm1191_vm10, %v2602_v11, 0.0 }
 0x2b0   : > { %v2604_v13 = vpop.eup %2603  ;;  %1253 = vadd.xlane.f32.xlu0 %v1252_v12 }
 0x2b1   : > { %v1255_v8 = vsel %vm1191_vm10, %v2604_v13, 0.0 }
 0x2b2   : > { %1256 = vadd.xlane.f32.xlu1 %v1255_v8 }
 0x2b6   : > { %v3210_v14 = vpop.eup %2605 }
 0x2b7   : > { %v1258_v16 = vsel %vm1191_vm10, %v3210_v14, 0.0 }
 0x2b8   : > { %v3214_v18 = vpop.eup %2607  ;;  %1259 = vadd.xlane.f32.xlu0 %v1258_v16 }
 0x2b9   : > { %v1261_v19 = vsel %vm1191_vm10, %v3214_v18, 0.0 }
 0x2ba   : > { %1262 = vadd.xlane.f32.xlu1 %v1261_v19 }
 0x329   : > { %v1242_v20 = vpop.xlane.xlu0 %1241 }
 0x32a   : > { %2609 = vrcp.f32 %v1242_v20 }
 0x32d   : > { %v1245_v15 = vpop.xlane.xlu1 %1244 }
 0x32e   : > { %2611 = vrcp.f32 %v1245_v15 }
 0x331   : > { %v1248_v22 = vpop.xlane.xlu0 %1247 }
 0x332   : > { %2613 = vrcp.f32 %v1248_v22 }
 0x335   : > { %v1251_v23 = vpop.xlane.xlu1 %1250 }
 0x336   : > { %2615 = vrcp.f32 %v1251_v23 }
 0x337   : > { %v2610_v25 = vpop.eup %2609 }
 0x338   : > { %v1272_v30 = vmul.f32 %v2610_v25, %v2594_v56 }
 0x339   : > { %v1254_v31 = vpop.xlane.xlu0 %1253 }
 0x33a   : > { %2617 = vrcp.f32 %v1254_v31  ;;  %v1280_v35 = vpack.c.bf16 %v1272_v30, %v1272_v30 }
 0x33b   : > { %v2612_v37 = vpop.eup %2611  ;;  %v1257_v38 = vpop.xlane.xlu1 %1256 }
 0x33c   : > { %2619 = vrcp.f32 %v1257_v38  ;;  %2411 = vmatmul.mubr.msk.bf16.vlgmr.msra.gmra.mxu1 %vm1288_vm11, %v1280_v35  ;;  %v1273_v39 = vmul.f32 %v2612_v37, %v2596_v60  ;;  %v2586_v60 = vld [vmem:[#allocation8] sm:$0xff]  }
 0x33d   : > { %2421 = vmatpush3.bf16.msra.mxu1 %v3105_v17  ;;  %2422 = vmatprep.mubr.msk.bf16.mxu1 %vm2837_vm8, %v2836_v27 }
 0x33e   : > { %v1281_v40 = vpack.c.bf16 %v1273_v39, %v1273_v39  ;;  %2432 = vmatprep.subr.bf16.mxu1 %v2836_v27 }
 0x33f   : > { %v2614_v41 = vpop.eup %2613 }
 0x340   : > { %2417 = vmatmul.mubr.msk.bf16.vlgmr.msra.gmra.mxu0 %vm1288_vm11, %v1281_v40  ;;  %v1274_v42 = vmul.f32 %v2614_v41, %v2598_v63 }
 0x341   : > { %2427 = vmatpush3.bf16.msra.mxu0 %v3113_v24  ;;  %v1260_v44 = vpop.xlane.xlu0 %1259  ;;  %2428 = vmatprep.mubr.msk.bf16.mxu0 %vm2837_vm8, %v2836_v27 }
 0x342   : > { %2621 = vrcp.f32 %v1260_v44  ;;  %v1282_v45 = vpack.c.bf16 %v1274_v42, %v1274_v42  ;;  %2438 = vmatprep.subr.bf16.mxu0 %v2836_v27 }
 0x343   : > { %v2616_v17 = vpop.eup %2615  ;;  %v1263_v46 = vpop.xlane.xlu1 %1262 }
 0x344   : > { %2623 = vrcp.f32 %v1263_v46  ;;  %2423 = vmatmul.mubr.msk.bf16.vlgmr.msra.gmra.mxu1 %vm1288_vm11, %v1282_v45  ;;  %v1275_v50 = vmul.f32 %v2616_v17, %v2600_v4 }
 0x345   : > { %2433 = vmatpush3.bf16.msra.mxu1 %v3119_v43  ;;  %2434 = vmatprep.mubr.msk.bf16.mxu1 %vm2837_vm8, %v2836_v27 }
 0x346   : > { %v1283_v24 = vpack.c.bf16 %v1275_v50, %v1275_v50  ;;  %2444 = vmatprep.subr.bf16.mxu1 %v2836_v27 }
 0x347   : > { %v2618_v52 = vpop.eup %2617 }
 0x348   : > { %2429 = vmatmul.mubr.msk.bf16.vlgmr.msra.gmra.mxu0 %vm1288_vm11, %v1283_v24  ;;  %v1276_v54 = vmul.f32 %v2618_v52, %v2602_v11 }
 0x349   : > { %v2620_v55 = vpop.eup %2619  ;;  %2439 = vmatpush3.bf16.msra.mxu0 %v1524_v53  ;;  %2440 = vmatprep.mubr.msk.bf16.mxu0 %vm2837_vm8, %v2836_v27 }
 0x34a   : > { %v1284_v21 = vpack.c.bf16 %v1276_v54, %v1276_v54  ;;  %2450 = vmatprep.subr.bf16.mxu0 %v2836_v27  ;;  %v1277_v43 = vmul.f32 %v2620_v55, %v2604_v13 }
 0x34c   : > { %2435 = vmatmul.mubr.msk.bf16.vlgmr.msra.gmra.mxu1 %vm1288_vm11, %v1284_v21  ;;  %v1285_v56 = vpack.c.bf16 %v1277_v43, %v1277_v43 }
 0x34d   : > { %2445 = vmatpush3.bf16.msra.mxu1 %v3116_v36  ;;  %2446 = vmatprep.mubr.msk.bf16.mxu1 %vm2837_vm8, %v2836_v27 }
 0x34e   : > { %2456 = vmatprep.subr.bf16.mxu1 %v2836_v27 }
 0x34f   : > { %v2622_v57 = vpop.eup %2621 }
 0x350   : > { %2441 = vmatmul.mubr.msk.bf16.vlgmr.msra.gmra.mxu0 %vm1288_vm11, %v1285_v56  ;;  %v1278_v26 = vmul.f32 %v2622_v57, %v3210_v14 }
 0x351   : > { %v2624_v58 = vpop.eup %2623  ;;  %2451 = vmatpush3.bf16.msra.mxu0 %v3122_v49  ;;  %2452 = vmatprep.mubr.msk.bf16.mxu0 %vm2837_vm8, %v2836_v27  ;;  %v2585_v49 = vld [vmem:[#allocation8 + $0x8] sm:$0xff]  }
 0x352   : > { %v1286_v59 = vpack.c.bf16 %v1278_v26, %v1278_v26  ;;  %v1279_v36 = vmul.f32 %v2624_v58, %v3214_v18  ;;  %2464 = vmatprep.subr.bf16.mxu0 %v2836_v27 }
 0x354   : > { %2447 = vmatmul.mubr.msk.bf16.vlgmr.msra.gmra.mxu1 %vm1288_vm11, %v1286_v59  ;;  %v1287_v34 = vpack.c.bf16 %v1279_v36, %v1279_v36 }
 0x355   : > { %2460 = vmatprep.mubr.msk.bf16.mxu1 %vm2837_vm8, %v2836_v27  ;;  %2457 = vmatpush3.bf16.msra.mxu1 %v2585_v49 }
 0x356   : > { %2458 = vmatprep.subr.bf16.mxu1 %v2836_v27 }
 0x358   : > { %2453 = vmatmul.mubr.msk.bf16.vlgmr.msra.gmra.mxu0 %vm1288_vm11, %v1287_v34 }
 0x359   : > { %2468 = vmatprep.mubr.msk.bf16.mxu0 %vm2837_vm8, %v2836_v27  ;;  %2459 = vmatpush3.bf16.msra.mxu1 %v2586_v60 }
 0x35a   : > { %2472 = vmatprep.subr.bf16.mxu1 %v2836_v27 }
 0x3fc   : > { %v1330_v47 = vpop.f32.mrf.mxu1 }
 0x3fd   : > { %v1666_v39 = vpack.c.bf16 %v1330_v47, %v1330_v47 }
 0x3fe   : > { %v2412_v61 = vpop.f32.mrf.mxu1 }
 0x3ff   : > { %v1686_v52 = vunpack.c.l.b16 %v1666_v39 }
 0x400   : > { %v1333_v51 = vpop.f32.mrf.mxu1  ;;  %v1376_v63 = vpop.f32.mrf.mxu0 }
 0x401   : > { %v1667_v16 = vpack.c.bf16 %v1376_v63, %v1376_v63 }
 0x402   : > { %v2413_v0 = vpop.f32.mrf.mxu1  ;;  %v2418_v2 = vpop.f32.mrf.mxu0 }
 0x403   : > { %v1687_v30 = vunpack.c.l.b16 %v1667_v16  ;;  %v1661_v16 = vunpack.c.l.bf16 %v3031_v10 }
 0x404   : > { %v1379_v62 = vpop.f32.mrf.mxu0  ;;  %v1422_v3 = vpop.f32.mrf.mxu1 }
 0x405   : > { %v1668_v18 = vpack.c.bf16 %v1422_v3, %v1422_v3  ;;  %v1694_v45 = vrot.slane %v1687_v30, 7 }
 0x406   : > { %v2419_v1 = vpop.f32.mrf.mxu0  ;;  %v2424_v4 = vpop.f32.mrf.mxu1 }
 0x407   : > { %v1688_v35 = vunpack.c.l.b16 %v1668_v18  ;;  %v1695_v56 = vsel %vm673_vm1, %v1694_v45, %v1686_v52  ;;  %v2587_v1 = vld [vmem:[#allocation10 + $0x8] sm:$0xff]   ;;  %v2588_v4 = vld [vmem:[#allocation10] sm:$0xff]   ;;  %v1662_v18 = vunpack.c.l.bf16 %v3050_v28 }
 0x408   : > { %v1425_v7 = vpop.f32.mrf.mxu1  ;;  %v1468_v11 = vpop.f32.mrf.mxu0  ;;  %2465 = vmatpush3.bf16.msra.mxu0 %v2587_v1 }
 0x409   : > { %v1669_v15 = vpack.c.bf16 %v1468_v11, %v1468_v11  ;;  %v1696_v48 = vrot.slane %v1688_v35, 6  ;;  %2466 = vmatprep.subr.bf16.mxu0 %v2836_v27  ;;  %v2589_v7 = vld [vmem:[%s3355_s8 + $0x18] sm:$0xff]   ;;  %v2590_v11 = vld [vmem:[%s3355_s8 + $0x10] sm:$0xff]  }
 0x40a   : > { %v2425_v12 = vpop.f32.mrf.mxu1  ;;  %v2430_v13 = vpop.f32.mrf.mxu0 }
 0x40b   : > { %v1689_v40 = vunpack.c.l.b16 %v1669_v15  ;;  %v1697_v58 = vsel %vm676_vm2, %v1696_v48, %v1695_v56  ;;  %v2591_v12 = vld [vmem:[%s3355_s8 + $0x8] sm:$0xff]   ;;  %v1658_v13 = vunpack.c.l.bf16 %v3025_v5  ;;  %v1665_v15 = vunpack.c.l.bf16 %v3060_v33 }
 0x40c   : > { %v1471_v8 = vpop.f32.mrf.mxu0  ;;  %v1514_v14 = vpop.f32.mrf.mxu1  ;;  %2467 = vmatpush3.bf16.msra.mxu0 %v2588_v4 }
 0x40d   : > { %v1670_v22 = vpack.c.bf16 %v1514_v14, %v1514_v14  ;;  %v1698_v53 = vrot.slane %v1689_v40, 5  ;;  %v1659_v8 = vunpack.c.l.bf16 %v3027_v6  ;;  %v1660_v14 = vunpack.c.l.bf16 %v3029_v9 }
 0x40e   : > { %v2431_v19 = vpop.f32.mrf.mxu0  ;;  %v2436_v20 = vpop.f32.mrf.mxu1 }
 0x40f   : > { %v1690_v41 = vunpack.c.l.b16 %v1670_v22  ;;  %v1699_v49 = vsel %vm679_vm3, %v1698_v53, %v1697_v58  ;;  %v1663_v19 = vunpack.c.l.bf16 %v3052_v29  ;;  %v1664_v20 = vunpack.c.l.bf16 %v3058_v32 }
 0x410   : > { %v1517_v23 = vpop.f32.mrf.mxu1  ;;  %v1560_v25 = vpop.f32.mrf.mxu0 }
 0x411   : > { %v1671_v31 = vpack.c.bf16 %v1560_v25, %v1560_v25  ;;  %v1700_v55 = vrot.slane %v1690_v41, 4 }
 0x412   : > { %v2437_v37 = vpop.f32.mrf.mxu1  ;;  %v2442_v38 = vpop.f32.mrf.mxu0 }
 0x413   : > { %v1691_v17 = vunpack.c.l.b16 %v1671_v31  ;;  %v1701_v47 = vsel %vm682_vm4, %v1700_v55, %v1699_v49 }
 0x414   : > { %v1563_v42 = vpop.f32.mrf.mxu0  ;;  %v1606_v44 = vpop.f32.mrf.mxu1 }
 0x415   : > { %v1672_v46 = vpack.c.bf16 %v1606_v44, %v1606_v44  ;;  %v1702_v57 = vrot.slane %v1691_v17, 3 }
 0x416   : > { %v2443_v50 = vpop.f32.mrf.mxu0  ;;  %v2448_v24 = vpop.f32.mrf.mxu1 }
 0x417   : > { %v1692_v54 = vunpack.c.l.b16 %v1672_v46  ;;  %v1703_v51 = vsel %vm685_vm5, %v1702_v57, %v1701_v47 }
 0x418   : > { %v1609_v21 = vpop.f32.mrf.mxu1  ;;  %v1652_v43 = vpop.f32.mrf.mxu0 }
 0x419   : > { %v1673_v26 = vpack.c.bf16 %v1652_v43, %v1652_v43  ;;  %v1704_v59 = vrot.slane %v1692_v54, 2 }
 0x41a   : > { %v2449_v36 = vpop.f32.mrf.mxu1  ;;  %v2454_v34 = vpop.f32.mrf.mxu0 }
 0x41b   : > { %v1693_v60 = vunpack.c.l.b16 %v1673_v26  ;;  %v1705_v0 = vsel %vm688_vm6, %v1704_v59, %v1703_v51 }
 0x41c   : > { %v1655_v61 = vpop.f32.mrf.mxu0 }
 0x41d   : > { %v1706_v63 = vrot.slane %v1693_v60, 1 }
 0x41e   : > { %v2455_v2 = vpop.f32.mrf.mxu0 }
 0x41f   : > { %v1707_v62 = vsel %vm691_vm7, %v1706_v63, %v1705_v0 }
 0x420   : > { %v1708_v3 = vpack.c.b16 %v1707_v62, %v1707_v62 }
 0x422   : > { %2461 = vmatmul.mubr.msk.bf16.vlgmr.msra.gmra.mxu1 %vm477_vm0, %v1708_v3  ;;  %v2592_v3 = vld [vmem:[%s3355_s8] sm:$0xff]  }
 0x423   : > { %2480 = vmatprep.mubr.msk.bf16.mxu1 %vm2837_vm8, %v2836_v27  ;;  %2473 = vmatpush3.bf16.msra.mxu1 %v2589_v7 }
 0x424   : > { %2474 = vmatprep.subr.bf16.mxu1 %v2836_v27 }
 0x427   : > { %2475 = vmatpush3.bf16.msra.mxu1 %v2590_v11 }
 0x428   : > { %2476 = vmatprep.subr.bf16.mxu1 %v2836_v27 }
 0x42b   : > { %2477 = vmatpush3.bf16.msra.mxu1 %v2591_v12 }
 0x42c   : > { %2478 = vmatprep.subr.bf16.mxu1 %v2836_v27 }
 0x42f   : > { %2479 = vmatpush3.bf16.msra.mxu1 %v2592_v3 }
 0x4e2   : > { %v1758_v22 = vpop.f32.mrf.mxu1 }
 0x4e3   : > { %v1765_v23 = vrot.slane %v1758_v22, 1  ;;  %v1766_v25 = vrot.slane %v1758_v22, 2  ;;  %v1767_v27 = vrot.slane %v1758_v22, 3  ;;  %v1768_v30 = vrot.slane %v1758_v22, 4 }
 0x4e4   : > { %v1769_v5 = vrot.slane %v1758_v22, 5  ;;  %v1770_v31 = vrot.slane %v1758_v22, 6  ;;  %v1771_v6 = vrot.slane %v1758_v22, 7  ;;  %v1780_v35 = vadd.f32 %v1758_v22, %v1658_v13  ;;  %v2462_v9 = vpop.f32.mrf.mxu1 }
 0x4e5   : > { %v1781_v37 = vadd.f32 %v1765_v23, %v1659_v8  ;;  %v1782_v10 = vadd.f32 %v1766_v25, %v1660_v14  ;;  %v1783_v38 = vadd.f32 %v1767_v27, %v1661_v16  ;;  %v1784_v28 = vadd.f32 %v1768_v30, %v1662_v18 }
 0x4e6   : > { %v1785_v39 = vadd.f32 %v1769_v5, %v1663_v19  ;;  %v1786_v29 = vadd.f32 %v1770_v31, %v1664_v20  ;;  %v1788_v40 = vpack.c.bf16 %v1780_v35, %v1780_v35  ;;  %v1761_v32 = vpop.f32.mrf.mxu1  ;;  %v1787_v41 = vadd.f32 %v1771_v6, %v1665_v15 }
 0x4e7   : > { %v1789_v33 = vpack.c.bf16 %v1781_v37, %v1781_v37  ;;  %v1790_v42 = vpack.c.bf16 %v1782_v10, %v1782_v10  ;;  %v1791_v44 = vpack.c.bf16 %v1783_v38, %v1783_v38  ;;  %v1792_v45 = vpack.c.bf16 %v1784_v28, %v1784_v28 }
 0x4e8   : > { %v2463_v17 = vpop.f32.mrf.mxu1  ;;  %v1793_v46 = vpack.c.bf16 %v1785_v39, %v1785_v39  ;;  %v1794_v48 = vpack.c.bf16 %v1786_v29, %v1786_v29  ;;  %v1795_v53 = vpack.c.bf16 %v1787_v41, %v1787_v41  ;;  %v1808_v55 = vunpack.c.l.b16 %v1788_v40 }
 0x4e9   : > { %v1809_v50 = vunpack.c.l.b16 %v1789_v33  ;;  %v1810_v24 = vunpack.c.l.b16 %v1790_v42  ;;  %v1811_v52 = vunpack.c.l.b16 %v1791_v44  ;;  %v1812_v54 = vunpack.c.l.b16 %v1792_v45 }
 0x4ea   : > { %v1813_v56 = vunpack.c.l.b16 %v1793_v46  ;;  %v1814_v57 = vunpack.c.l.b16 %v1794_v48  ;;  %v1815_v58 = vunpack.c.l.b16 %v1795_v53 }
 0x4eb   : > { %v1816_v21 = vrot.slane %v1809_v50, 7  ;;  %v1818_v43 = vrot.slane %v1810_v24, 6  ;;  %v1820_v26 = vrot.slane %v1811_v52, 5  ;;  %v1822_v34 = vrot.slane %v1812_v54, 4 }
 0x4ec   : > { %v1824_v60 = vrot.slane %v1813_v56, 3  ;;  %v1826_v61 = vrot.slane %v1814_v57, 2  ;;  %v1828_v63 = vrot.slane %v1815_v58, 1 }
 0x4ed   : > { %v1817_v59 = vsel %vm673_vm1, %v1816_v21, %v1808_v55 }
 0x4ee   : > { %v1819_v36 = vsel %vm676_vm2, %v1818_v43, %v1817_v59 }
 0x4ef   : > { %v1821_v49 = vsel %vm679_vm3, %v1820_v26, %v1819_v36 }
 0x4f0   : > { %v1823_v47 = vsel %vm682_vm4, %v1822_v34, %v1821_v49 }
 0x4f1   : > { %v1825_v51 = vsel %vm685_vm5, %v1824_v60, %v1823_v47 }
 0x4f2   : > { %v1827_v0 = vsel %vm688_vm6, %v1826_v61, %v1825_v51 }
 0x4f3   : > { %v1829_v2 = vsel %vm691_vm7, %v1828_v63, %v1827_v0 }
 0x4f4   : > { %v1830_v62 = vpack.c.b16 %v1829_v2, %v1829_v2 }
 0x4f6   : > { %2469 = vmatmul.mubr.msk.bf16.vlgmr.msra.gmra.mxu0 %vm477_vm0, %v1830_v62 }
 0x5b6   : > { %v1880_v1 = vpop.f32.mrf.mxu0 }
 0x5b7   : > { %v1886_v4 = vmax.f32 %v1880_v1, 0.0 }
 0x5b8   : > { %v2470_v7 = vpop.f32.mrf.mxu0 }
 0x5b9   : > { %v1887_v11 = vpack.c.bf16 %v1886_v4, %v1886_v4 }
 0x5ba   : > { %v1883_v12 = vpop.f32.mrf.mxu0 }
 0x5bb   : > { %2481 = vmatmul.mubr.msk.bf16.vlgmr.msra.gmra.mxu1 %vm1920_vm12, %v1887_v11 }
 0x5bc   : > { %v2471_v13 = vpop.f32.mrf.mxu0 }
 0x67b   : > { %v1958_v8 = vpop.f32.mrf.mxu1 }
 0x67c   : > { %v1965_v14 = vrot.slane %v1958_v8, 1  ;;  %v1966_v16 = vrot.slane %v1958_v8, 2  ;;  %v1967_v18 = vrot.slane %v1958_v8, 3  ;;  %v1968_v19 = vrot.slane %v1958_v8, 4 }
 0x67d   : > { %v1969_v20 = vrot.slane %v1958_v8, 5  ;;  %v1970_v15 = vrot.slane %v1958_v8, 6  ;;  %v1971_v22 = vrot.slane %v1958_v8, 7  ;;  %v1980_v23 = vadd.f32 %v1958_v8, %v1780_v35  ;;  %v2482_v25 = vpop.f32.mrf.mxu1 }
 0x67e   : > { %v1981_v27 = vadd.f32 %v1965_v14, %v1781_v37  ;;  %v1982_v30 = vadd.f32 %v1966_v16, %v1782_v10  ;;  %v1983_v5 = vadd.f32 %v1967_v18, %v1783_v38  ;;  %v1984_v31 = vadd.f32 %v1968_v19, %v1784_v28 }
 0x67f   : > { %v1985_v6 = vadd.f32 %v1969_v20, %v1785_v39  ;;  %v1986_v9 = vadd.f32 %v1970_v15, %v1786_v29  ;;  %v2262_v40 = vpack.c.bf16 %v1980_v23, %v1980_v23  ;;  %v1961_v32 = vpop.f32.mrf.mxu1  ;;  %v1987_v33 = vadd.f32 %v1971_v22, %v1787_v41 }
 0x680   : > { %v2263_v42 = vpack.c.bf16 %v1981_v27, %v1981_v27  ;;  %v2264_v44 = vpack.c.bf16 %v1982_v30, %v1982_v30  ;;  %v2265_v45 = vpack.c.bf16 %v1983_v5, %v1983_v5  ;;  %v2266_v17 = vpack.c.bf16 %v1984_v31, %v1984_v31 }
 0x681   : > { %v2267_v46 = vpack.c.bf16 %v1985_v6, %v1985_v6  ;;  %v2483_v48 = vpop.f32.mrf.mxu1  ;;  %v2268_v35 = vpack.c.bf16 %v1986_v9, %v1986_v9  ;;  %v2269_v10 = vpack.c.bf16 %v1987_v33, %v1987_v33  ;;  %v2020_v28 = vunpack.c.l.b16 %v2262_v40 }
 0x682   : > { %v2021_v50 = vunpack.c.l.b16 %v2263_v42  ;;  %v2022_v24 = vunpack.c.l.b16 %v2264_v44  ;;  %v2023_v37 = vunpack.c.l.b16 %v2265_v45  ;;  %v2024_v38 = vunpack.c.l.b16 %v2266_v17 }
 0x683   : > { %v2025_v39 = vunpack.c.l.b16 %v2267_v46  ;;  %v2026_v41 = vunpack.c.l.b16 %v2268_v35  ;;  %v2027_v55 = vunpack.c.l.b16 %v2269_v10 }
 0x684   : > { %v2028_v29 = vrot.slane %v2021_v50, 7  ;;  %v2030_v52 = vrot.slane %v2022_v24, 6  ;;  %v2032_v54 = vrot.slane %v2023_v37, 5  ;;  %v2034_v21 = vrot.slane %v2024_v38, 4 }
 0x685   : > { %v2036_v57 = vrot.slane %v2025_v39, 3  ;;  %v2038_v58 = vrot.slane %v2026_v41, 2  ;;  %v2040_v36 = vrot.slane %v2027_v55, 1 }
 0x686   : > { %v2029_v53 = vsel %vm673_vm1, %v2028_v29, %v2020_v28 }
 0x687   : > { %v2031_v43 = vsel %vm676_vm2, %v2030_v52, %v2029_v53 }
 0x688   : > { %v2033_v56 = vsel %vm679_vm3, %v2032_v54, %v2031_v43 }
 0x689   : > { %v2035_v26 = vsel %vm682_vm4, %v2034_v21, %v2033_v56 }
 0x68a   : > { %v2037_v59 = vsel %vm685_vm5, %v2036_v57, %v2035_v26 }
 0x68b   : > { %v2039_v34 = vsel %vm688_vm6, %v2038_v58, %v2037_v59 }
 0x68c   : > { %v2041_v49 = vsel %vm691_vm7, %v2040_v36, %v2039_v34 }
 0x68d   : > { %v2042_v60 = vpack.c.b16 %v2041_v49, %v2041_v49 }
 0x68f   : > { %2045 = vst.msk [vmem:[%s411_s25] sm:$0xf] %vm2044_vm13, %v2042_v60 }
 0x690   : > { %2768 = shalt.err (!%p2765_p0)
}
 0x691   : > { %s2769_s14 = scalar_lea.hbm %s2058_s24, 64  ;;  %s2773_s22 = scalar_lea.hbm %s3356_s9, 128 }
 0x692   : > { %p2770_p3 = scmp.ne.s32.totalorder %s2058_s24, %s2769_s14  ;;  %p2774_p12 = scmp.lt.s32.totalorder %s2058_s24, %s3356_s9 }
 0x693   : > { %p2775_p10 = scmp.lt.s32.totalorder %s2773_s22, %s2769_s14 }
 0x694   : > { %p2771_p1 = pnand %p2770_p3, %p2928_p5 }
 0x695   : > { %p2776_p4 = por %p2775_p10, %p2774_p12 }
 0x696   : > { %p2772_p2 = pneg %p2771_p1 }
 0x698   : > { %p2777_p7 = pnand %p2776_p4, %p2772_p2 }
 0x69a   : > { %2780 = shalt.err (!%p2777_p7)
}
 0x69b   : > { %2504 = dma.vmem_to_hbm [thread:$0]  (%p2928_p5), %s2061_s16, 64, %s2058_s24, %s2047_s29  }
 0x69c PF: > { %p2536_p9 = scmp.ge.s32.totalorder %s2827_s12, 2  ;;  %s2072_s21 = sand.u32 1, %s2815_s30  }
 0x69d   : > { %s2073_s17 = scalar_lea.sflag [#allocation4], %s2072_s21 }
 0x69e   : > { %p2523_p8 = pnand %p2536_p9, %p2932_p6 }
 0x6a0   : > { %p2524_p11 = pneg %p2523_p8 }
 0x6a2   : > { %2810 = dma.done.wait (%p2524_p11), %s2073_s17, 64  }
 0x6a3   : > { %2812 = vsyncadd (%p2524_p11), %s2073_s17, 4294967232  ;;  %s3373_s13 = sld [smem:[#allocation16_spill]]  ;;  %p22_p13 = scmp.ge.s32.totalorder %s2915_s15, 4  }
 0x6a4   : > { %s3374_s30 = smov %s2819_s10  ;;  %s3375_s10 = smov %s2823_s11 }
 0x6a5   : > { %s3377_s12 = smov %s2915_s15  ;;  %24 = sbr.rel (!%p22_p13) target bundleno = 6 (0x6), region = 115 }
 0x6a9   : > { %s3376_s11 = smov %s3373_s13 }
 0x6aa   :  { %2078 = vsyncpa [#allocation3], 1 }
 0x6ab   :  { %2080 = vsyncpa [#allocation3 + $0x1], 1 }
 0x6ac   :  { %2081 = vsyncpa [#allocation6], 1 }
 0x6ad   :  { %2082 = vsyncpa [#allocation9], 1 }
 0x6ae   :  { %2083 = vsyncpa [#allocation4], 1 }
 0x6af   :  { %2085 = vsyncpa [#allocation4 + $0x1], 1 }

</bundles_post_ra>
